<compile_context>
chip_gen: v7x
topology: tpu7x:2x2x1
jax: 0.10.0
libtpu: 0.0.40
codegen_flags: <defaults>
</compile_context>

<pallas_src>
import jax
import jax.numpy as jnp
from jax import lax
from jax.experimental import pallas as pl
from jax.experimental.pallas import tpu as pltpu

K = 5       # conv kernel size
PAD = 2     # conv padding (same-length output)
EPS = 1e-5  # BatchNorm1d default eps


def residual_block_kernel(x_ref, w1_ref, w2_ref, gamma_ref, beta_ref,
                          out_ref, pad_ref):
    # x_ref    : (N, Cin, L)        VMEM, native dtype (NCL, L on lanes)
    # w1_ref   : (K*Cin, Cout, 1)   VMEM f32, row k*Cin+ci holds w[:, ci, k]
    # w2_ref   : (K*Cin, Cout, 1)   VMEM f32
    # gamma_ref: (Cout, 1)          VMEM f32
    # beta_ref : (Cout, 1)          VMEM f32
    # out_ref  : (N, Cout, L)       VMEM
    # pad_ref  : (N, Cin, L+2*PAD)  VMEM f32 scratch (zero halo, reused twice)
    N, Cin, L = x_ref.shape
    Cout = out_ref.shape[1]
    inv_n = 1.0 / float(N * L)

    # ---- zero ONLY the halo columns, once (interior is always overwritten) ----
    pad_ref[:, :, :PAD] = jnp.zeros((N, Cin, PAD), jnp.float32)
    pad_ref[:, :, PAD + L:] = jnp.zeros((N, Cin, PAD), jnp.float32)

    def conv(w_ref):
        # Cout-vectorized 5-tap conv: per tap k, one (N, Cin, L) lane-offset
        # load, Cin sublane-broadcast FMAs into an (N, Cout, L) partial.
        parts = []
        for k in range(K):
            tap = pad_ref[:, :, k:k + L]                       # (N, Cin, L)
            p = w_ref[k * Cin] * tap[:, 0:1, :]                # (Cout,1)*(N,1,L)
            for ci in range(1, Cin):
                p = p + w_ref[k * Cin + ci] * tap[:, ci:ci + 1, :]
            parts.append(p)                                    # (N, Cout, L)
        # tree-add the K independent partial accumulators
        while len(parts) > 1:
            nxt = [parts[i] + parts[i + 1] for i in range(0, len(parts) - 1, 2)]
            if len(parts) % 2:
                nxt.append(parts[-1])
            parts = nxt
        return parts[0]                                        # (N, Cout, L) f32

    def bn(h):
        # Training-mode BatchNorm (batch stats, biased variance), two-pass
        # centered form, folded to per-channel (Cout, 1) scale/bias.
        mean = jnp.sum(jnp.sum(h, axis=0), axis=-1, keepdims=True) * inv_n
        d = h - mean
        var = jnp.sum(jnp.sum(d * d, axis=0), axis=-1, keepdims=True) * inv_n
        scale = gamma_ref[...] * lax.rsqrt(var + EPS)          # rsqrt -> EUP
        return d * scale + beta_ref[...]

    # ---- conv1 -> bn2 -> tanh ----
    pad_ref[:, :, PAD:PAD + L] = x_ref[...].astype(jnp.float32)
    h = jnp.tanh(bn(conv(w1_ref)))

    # ---- conv2 -> bn2 -> (+ identity residual, re-read from x_ref) -> tanh ----
    pad_ref[:, :, PAD:PAD + L] = h
    y = bn(conv(w2_ref)) + x_ref[...].astype(jnp.float32)
    out_ref[...] = jnp.tanh(y).astype(out_ref.dtype)


def residual_block(x_ncl, w1, w2, gamma, beta):
    """x_ncl: (N, C, L) like PyTorch; w1/w2: (Cout, Cin, K) Conv1d weights
    (bias=False); gamma/beta: (Cout,) BatchNorm1d affine (one bn2 used twice)."""
    N, Cin, L = x_ncl.shape
    Cout = w1.shape[0]
    assert Cin == Cout, "downsample=None requires in_channels == out_channels"
    assert w1.shape == (Cout, Cin, K) and w2.shape == (Cout, Cin, K)

    def prep_w(w):
        # (Cout, Cin, K) -> (K*Cin, Cout, 1); row k*Cin+ci holds w[:, ci, k]
        return jnp.transpose(w, (2, 1, 0)).reshape(K * Cin, Cout, 1).astype(jnp.float32)

    vmem = pl.BlockSpec(memory_space=pltpu.MemorySpace.VMEM)

    return pl.pallas_call(
        residual_block_kernel,
        out_shape=jax.ShapeDtypeStruct((N, Cout, L), x_ncl.dtype),
        in_specs=[vmem, vmem, vmem, vmem, vmem],
        out_specs=vmem,
        scratch_shapes=[pltpu.VMEM((N, Cin, L + 2 * PAD), jnp.float32)],
    )(x_ncl,                                   # native dtype; cast in-kernel
      prep_w(w1), prep_w(w2),
      gamma.reshape(Cout, 1).astype(jnp.float32),
      beta.reshape(Cout, 1).astype(jnp.float32))


def residual_block_reference(x, w1, w2, gamma, beta):
    """Pure-JAX reference mirroring the PyTorch forward (training-mode BN)."""
    def conv(a, w):
        return lax.conv_general_dilated(
            a, w, window_strides=(1,), padding=[(PAD, PAD)],
            dimension_numbers=("NCH", "OIH", "NCH"))

    def bn(y):
        mean = jnp.mean(y, axis=(0, 2), keepdims=True)
        var = jnp.mean((y - mean) ** 2, axis=(0, 2), keepdims=True)
        yn = (y - mean) / jnp.sqrt(var + EPS)
        return yn * gamma[None, :, None] + beta[None, :, None]

    out = jnp.tanh(bn(conv(x, w1)))
    out = bn(conv(out, w2)) + x
    return jnp.tanh(out)


if __name__ == "__main__":
    N, C, L = 2, 4, 16  # in_channels == out_channels == 4

    key = jax.random.PRNGKey(0)
    kx, kw1, kw2 = jax.random.split(key, 3)
    x = jax.random.normal(kx, (N, C, L), dtype=jnp.float32)
    # Conv1d weights (bias=False), PyTorch layout (Cout, Cin, K)
    w1 = jax.random.normal(kw1, (C, C, K), dtype=jnp.float32) * 0.2
    w2 = jax.random.normal(kw2, (C, C, K), dtype=jnp.float32) * 0.2
    # BatchNorm1d default init
    gamma = jnp.ones((C,), dtype=jnp.float32)
    beta = jnp.zeros((C,), dtype=jnp.float32)

    out = jax.block_until_ready(residual_block(x, w1, w2, gamma, beta))
    ref = jax.block_until_ready(residual_block_reference(x, w1, w2, gamma, beta))

    assert out.shape == (N, C, L)
    assert jnp.allclose(out, ref, atol=1e-4, rtol=1e-4), "mismatch vs JAX reference"

    print("KERNEL_OK")
</pallas_src>

<mosaic_0001>
module attributes {stable_mosaic.version = 11 : i64} {
  func.func @residual_block_kernel(%arg0: memref<2x4x16xf32, #tpu.memory_space<vmem>>, %arg1: memref<20x4x1xf32, #tpu.memory_space<vmem>>, %arg2: memref<20x4x1xf32, #tpu.memory_space<vmem>>, %arg3: memref<4x1xf32, #tpu.memory_space<vmem>>, %arg4: memref<4x1xf32, #tpu.memory_space<vmem>>, %arg5: memref<2x4x16xf32, #tpu.memory_space<vmem>>, %arg6: memref<2x4x20xf32, #tpu.memory_space<vmem>>) attributes {dimension_semantics = [], scalar_prefetch = 0 : i64, scratch_operands = 1 : i64, tpu.core_type = #tpu.core_type<tc>} {
    %cst = arith.constant 0.000000e+00 : f32
    %0 = vector.broadcast %cst : f32 to vector<2x4x2xf32>
    %c0 = arith.constant 0 : index
    %c0_0 = arith.constant 0 : index
    %c0_1 = arith.constant 0 : index
    %1 = vector.load %arg6[%c0, %c0_0, %c0_1] : memref<2x4x20xf32, #tpu.memory_space<vmem>>, vector<2x4x2xf32>
    tpu.vector_store %arg6[%c0, %c0_0, %c0_1], %0 {strides = array<i32>} : memref<2x4x20xf32, #tpu.memory_space<vmem>>, vector<2x4x2xf32>,
    %cst_2 = arith.constant 0.000000e+00 : f32
    %2 = vector.broadcast %cst_2 : f32 to vector<2x4x2xf32>
    %c0_3 = arith.constant 0 : index
    %c0_4 = arith.constant 0 : index
    %c18 = arith.constant 18 : index
    %3 = vector.load %arg6[%c0_3, %c0_4, %c18] : memref<2x4x20xf32, #tpu.memory_space<vmem>>, vector<2x4x2xf32>
    tpu.vector_store %arg6[%c0_3, %c0_4, %c18], %2 {strides = array<i32>} : memref<2x4x20xf32, #tpu.memory_space<vmem>>, vector<2x4x2xf32>,
    %c0_5 = arith.constant 0 : index
    %c0_6 = arith.constant 0 : index
    %c0_7 = arith.constant 0 : index
    %4 = vector.load %arg0[%c0_5, %c0_6, %c0_7] : memref<2x4x16xf32, #tpu.memory_space<vmem>>, vector<2x4x16xf32>
    %c0_8 = arith.constant 0 : index
    %c0_9 = arith.constant 0 : index
    %c2 = arith.constant 2 : index
    %5 = vector.load %arg6[%c0_8, %c0_9, %c2] : memref<2x4x20xf32, #tpu.memory_space<vmem>>, vector<2x4x16xf32>
    tpu.vector_store %arg6[%c0_8, %c0_9, %c2], %4 {strides = array<i32>} : memref<2x4x20xf32, #tpu.memory_space<vmem>>, vector<2x4x16xf32>,
    %c0_10 = arith.constant 0 : index
    %c0_11 = arith.constant 0 : index
    %c0_12 = arith.constant 0 : index
    %6 = vector.load %arg6[%c0_10, %c0_11, %c0_12] : memref<2x4x20xf32, #tpu.memory_space<vmem>>, vector<2x4x16xf32>
    %c0_13 = arith.constant 0 : index
    %c0_14 = arith.constant 0 : index
    %c0_15 = arith.constant 0 : index
    %7 = vector.load %arg1[%c0_13, %c0_14, %c0_15] : memref<20x4x1xf32, #tpu.memory_space<vmem>>, vector<1x4x1xf32>
    %8 = vector.shape_cast %7 : vector<1x4x1xf32> to vector<4x1xf32>
    %9 = vector.extract_strided_slice %6 {offsets = [0, 0, 0], sizes = [2, 1, 16], strides = [1, 1, 1]} : vector<2x4x16xf32> to vector<2x1x16xf32>
    %10 = vector.shape_cast %8 : vector<4x1xf32> to vector<1x4x1xf32>
    %11 = vector.broadcast %10 : vector<1x4x1xf32> to vector<2x4x16xf32>
    %12 = vector.broadcast %9 : vector<2x1x16xf32> to vector<2x4x16xf32>
    %13 = arith.mulf %11, %12 : vector<2x4x16xf32>
    %c1 = arith.constant 1 : index
    %c0_16 = arith.constant 0 : index
    %c0_17 = arith.constant 0 : index
    %14 = vector.load %arg1[%c1, %c0_16, %c0_17] : memref<20x4x1xf32, #tpu.memory_space<vmem>>, vector<1x4x1xf32>
    %15 = vector.shape_cast %14 : vector<1x4x1xf32> to vector<4x1xf32>
    %16 = vector.extract_strided_slice %6 {offsets = [0, 1, 0], sizes = [2, 1, 16], strides = [1, 1, 1]} : vector<2x4x16xf32> to vector<2x1x16xf32>
    %17 = vector.shape_cast %15 : vector<4x1xf32> to vector<1x4x1xf32>
    %18 = vector.broadcast %17 : vector<1x4x1xf32> to vector<2x4x16xf32>
    %19 = vector.broadcast %16 : vector<2x1x16xf32> to vector<2x4x16xf32>
    %20 = arith.mulf %18, %19 : vector<2x4x16xf32>
    %21 = arith.addf %13, %20 : vector<2x4x16xf32>
    %c2_18 = arith.constant 2 : index
    %c0_19 = arith.constant 0 : index
    %c0_20 = arith.constant 0 : index
    %22 = vector.load %arg1[%c2_18, %c0_19, %c0_20] : memref<20x4x1xf32, #tpu.memory_space<vmem>>, vector<1x4x1xf32>
    %23 = vector.shape_cast %22 : vector<1x4x1xf32> to vector<4x1xf32>
    %24 = vector.extract_strided_slice %6 {offsets = [0, 2, 0], sizes = [2, 1, 16], strides = [1, 1, 1]} : vector<2x4x16xf32> to vector<2x1x16xf32>
    %25 = vector.shape_cast %23 : vector<4x1xf32> to vector<1x4x1xf32>
    %26 = vector.broadcast %25 : vector<1x4x1xf32> to vector<2x4x16xf32>
    %27 = vector.broadcast %24 : vector<2x1x16xf32> to vector<2x4x16xf32>
    %28 = arith.mulf %26, %27 : vector<2x4x16xf32>
    %29 = arith.addf %21, %28 : vector<2x4x16xf32>
    %c3 = arith.constant 3 : index
    %c0_21 = arith.constant 0 : index
    %c0_22 = arith.constant 0 : index
    %30 = vector.load %arg1[%c3, %c0_21, %c0_22] : memref<20x4x1xf32, #tpu.memory_space<vmem>>, vector<1x4x1xf32>
    %31 = vector.shape_cast %30 : vector<1x4x1xf32> to vector<4x1xf32>
    %32 = vector.extract_strided_slice %6 {offsets = [0, 3, 0], sizes = [2, 1, 16], strides = [1, 1, 1]} : vector<2x4x16xf32> to vector<2x1x16xf32>
    %33 = vector.shape_cast %31 : vector<4x1xf32> to vector<1x4x1xf32>
    %34 = vector.broadcast %33 : vector<1x4x1xf32> to vector<2x4x16xf32>
    %35 = vector.broadcast %32 : vector<2x1x16xf32> to vector<2x4x16xf32>
    %36 = arith.mulf %34, %35 : vector<2x4x16xf32>
    %37 = arith.addf %29, %36 : vector<2x4x16xf32>
    %c0_23 = arith.constant 0 : index
    %c0_24 = arith.constant 0 : index
    %c1_25 = arith.constant 1 : index
    %38 = vector.load %arg6[%c0_23, %c0_24, %c1_25] : memref<2x4x20xf32, #tpu.memory_space<vmem>>, vector<2x4x16xf32>
    %c4 = arith.constant 4 : index
    %c0_26 = arith.constant 0 : index
    %c0_27 = arith.constant 0 : index
    %39 = vector.load %arg1[%c4, %c0_26, %c0_27] : memref<20x4x1xf32, #tpu.memory_space<vmem>>, vector<1x4x1xf32>
    %40 = vector.shape_cast %39 : vector<1x4x1xf32> to vector<4x1xf32>
    %41 = vector.extract_strided_slice %38 {offsets = [0, 0, 0], sizes = [2, 1, 16], strides = [1, 1, 1]} : vector<2x4x16xf32> to vector<2x1x16xf32>
    %42 = vector.shape_cast %40 : vector<4x1xf32> to vector<1x4x1xf32>
    %43 = vector.broadcast %42 : vector<1x4x1xf32> to vector<2x4x16xf32>
    %44 = vector.broadcast %41 : vector<2x1x16xf32> to vector<2x4x16xf32>
    %45 = arith.mulf %43, %44 : vector<2x4x16xf32>
    %c5 = arith.constant 5 : index
    %c0_28 = arith.constant 0 : index
    %c0_29 = arith.constant 0 : index
    %46 = vector.load %arg1[%c5, %c0_28, %c0_29] : memref<20x4x1xf32, #tpu.memory_space<vmem>>, vector<1x4x1xf32>
    %47 = vector.shape_cast %46 : vector<1x4x1xf32> to vector<4x1xf32>
    %48 = vector.extract_strided_slice %38 {offsets = [0, 1, 0], sizes = [2, 1, 16], strides = [1, 1, 1]} : vector<2x4x16xf32> to vector<2x1x16xf32>
    %49 = vector.shape_cast %47 : vector<4x1xf32> to vector<1x4x1xf32>
    %50 = vector.broadcast %49 : vector<1x4x1xf32> to vector<2x4x16xf32>
    %51 = vector.broadcast %48 : vector<2x1x16xf32> to vector<2x4x16xf32>
    %52 = arith.mulf %50, %51 : vector<2x4x16xf32>
    %53 = arith.addf %45, %52 : vector<2x4x16xf32>
    %c6 = arith.constant 6 : index
    %c0_30 = arith.constant 0 : index
    %c0_31 = arith.constant 0 : index
    %54 = vector.load %arg1[%c6, %c0_30, %c0_31] : memref<20x4x1xf32, #tpu.memory_space<vmem>>, vector<1x4x1xf32>
    %55 = vector.shape_cast %54 : vector<1x4x1xf32> to vector<4x1xf32>
    %56 = vector.extract_strided_slice %38 {offsets = [0, 2, 0], sizes = [2, 1, 16], strides = [1, 1, 1]} : vector<2x4x16xf32> to vector<2x1x16xf32>
    %57 = vector.shape_cast %55 : vector<4x1xf32> to vector<1x4x1xf32>
    %58 = vector.broadcast %57 : vector<1x4x1xf32> to vector<2x4x16xf32>
    %59 = vector.broadcast %56 : vector<2x1x16xf32> to vector<2x4x16xf32>
    %60 = arith.mulf %58, %59 : vector<2x4x16xf32>
    %61 = arith.addf %53, %60 : vector<2x4x16xf32>
    %c7 = arith.constant 7 : index
    %c0_32 = arith.constant 0 : index
    %c0_33 = arith.constant 0 : index
    %62 = vector.load %arg1[%c7, %c0_32, %c0_33] : memref<20x4x1xf32, #tpu.memory_space<vmem>>, vector<1x4x1xf32>
    %63 = vector.shape_cast %62 : vector<1x4x1xf32> to vector<4x1xf32>
    %64 = vector.extract_strided_slice %38 {offsets = [0, 3, 0], sizes = [2, 1, 16], strides = [1, 1, 1]} : vector<2x4x16xf32> to vector<2x1x16xf32>
    %65 = vector.shape_cast %63 : vector<4x1xf32> to vector<1x4x1xf32>
    %66 = vector.broadcast %65 : vector<1x4x1xf32> to vector<2x4x16xf32>
    %67 = vector.broadcast %64 : vector<2x1x16xf32> to vector<2x4x16xf32>
    %68 = arith.mulf %66, %67 : vector<2x4x16xf32>
    %69 = arith.addf %61, %68 : vector<2x4x16xf32>
    %c0_34 = arith.constant 0 : index
    %c0_35 = arith.constant 0 : index
    %c2_36 = arith.constant 2 : index
    %70 = vector.load %arg6[%c0_34, %c0_35, %c2_36] : memref<2x4x20xf32, #tpu.memory_space<vmem>>, vector<2x4x16xf32>
    %c8 = arith.constant 8 : index
    %c0_37 = arith.constant 0 : index
    %c0_38 = arith.constant 0 : index
    %71 = vector.load %arg1[%c8, %c0_37, %c0_38] : memref<20x4x1xf32, #tpu.memory_space<vmem>>, vector<1x4x1xf32>
    %72 = vector.shape_cast %71 : vector<1x4x1xf32> to vector<4x1xf32>
    %73 = vector.extract_strided_slice %70 {offsets = [0, 0, 0], sizes = [2, 1, 16], strides = [1, 1, 1]} : vector<2x4x16xf32> to vector<2x1x16xf32>
    %74 = vector.shape_cast %72 : vector<4x1xf32> to vector<1x4x1xf32>
    %75 = vector.broadcast %74 : vector<1x4x1xf32> to vector<2x4x16xf32>
    %76 = vector.broadcast %73 : vector<2x1x16xf32> to vector<2x4x16xf32>
    %77 = arith.mulf %75, %76 : vector<2x4x16xf32>
    %c9 = arith.constant 9 : index
    %c0_39 = arith.constant 0 : index
    %c0_40 = arith.constant 0 : index
    %78 = vector.load %arg1[%c9, %c0_39, %c0_40] : memref<20x4x1xf32, #tpu.memory_space<vmem>>, vector<1x4x1xf32>
    %79 = vector.shape_cast %78 : vector<1x4x1xf32> to vector<4x1xf32>
    %80 = vector.extract_strided_slice %70 {offsets = [0, 1, 0], sizes = [2, 1, 16], strides = [1, 1, 1]} : vector<2x4x16xf32> to vector<2x1x16xf32>
    %81 = vector.shape_cast %79 : vector<4x1xf32> to vector<1x4x1xf32>
    %82 = vector.broadcast %81 : vector<1x4x1xf32> to vector<2x4x16xf32>
    %83 = vector.broadcast %80 : vector<2x1x16xf32> to vector<2x4x16xf32>
    %84 = arith.mulf %82, %83 : vector<2x4x16xf32>
    %85 = arith.addf %77, %84 : vector<2x4x16xf32>
    %c10 = arith.constant 10 : index
    %c0_41 = arith.constant 0 : index
    %c0_42 = arith.constant 0 : index
    %86 = vector.load %arg1[%c10, %c0_41, %c0_42] : memref<20x4x1xf32, #tpu.memory_space<vmem>>, vector<1x4x1xf32>
    %87 = vector.shape_cast %86 : vector<1x4x1xf32> to vector<4x1xf32>
    %88 = vector.extract_strided_slice %70 {offsets = [0, 2, 0], sizes = [2, 1, 16], strides = [1, 1, 1]} : vector<2x4x16xf32> to vector<2x1x16xf32>
    %89 = vector.shape_cast %87 : vector<4x1xf32> to vector<1x4x1xf32>
    %90 = vector.broadcast %89 : vector<1x4x1xf32> to vector<2x4x16xf32>
    %91 = vector.broadcast %88 : vector<2x1x16xf32> to vector<2x4x16xf32>
    %92 = arith.mulf %90, %91 : vector<2x4x16xf32>
    %93 = arith.addf %85, %92 : vector<2x4x16xf32>
    %c11 = arith.constant 11 : index
    %c0_43 = arith.constant 0 : index
    %c0_44 = arith.constant 0 : index
    %94 = vector.load %arg1[%c11, %c0_43, %c0_44] : memref<20x4x1xf32, #tpu.memory_space<vmem>>, vector<1x4x1xf32>
    %95 = vector.shape_cast %94 : vector<1x4x1xf32> to vector<4x1xf32>
    %96 = vector.extract_strided_slice %70 {offsets = [0, 3, 0], sizes = [2, 1, 16], strides = [1, 1, 1]} : vector<2x4x16xf32> to vector<2x1x16xf32>
    %97 = vector.shape_cast %95 : vector<4x1xf32> to vector<1x4x1xf32>
    %98 = vector.broadcast %97 : vector<1x4x1xf32> to vector<2x4x16xf32>
    %99 = vector.broadcast %96 : vector<2x1x16xf32> to vector<2x4x16xf32>
    %100 = arith.mulf %98, %99 : vector<2x4x16xf32>
    %101 = arith.addf %93, %100 : vector<2x4x16xf32>
    %c0_45 = arith.constant 0 : index
    %c0_46 = arith.constant 0 : index
    %c3_47 = arith.constant 3 : index
    %102 = vector.load %arg6[%c0_45, %c0_46, %c3_47] : memref<2x4x20xf32, #tpu.memory_space<vmem>>, vector<2x4x16xf32>
    %c12 = arith.constant 12 : index
    %c0_48 = arith.constant 0 : index
    %c0_49 = arith.constant 0 : index
    %103 = vector.load %arg1[%c12, %c0_48, %c0_49] : memref<20x4x1xf32, #tpu.memory_space<vmem>>, vector<1x4x1xf32>
    %104 = vector.shape_cast %103 : vector<1x4x1xf32> to vector<4x1xf32>
    %105 = vector.extract_strided_slice %102 {offsets = [0, 0, 0], sizes = [2, 1, 16], strides = [1, 1, 1]} : vector<2x4x16xf32> to vector<2x1x16xf32>
    %106 = vector.shape_cast %104 : vector<4x1xf32> to vector<1x4x1xf32>
    %107 = vector.broadcast %106 : vector<1x4x1xf32> to vector<2x4x16xf32>
    %108 = vector.broadcast %105 : vector<2x1x16xf32> to vector<2x4x16xf32>
    %109 = arith.mulf %107, %108 : vector<2x4x16xf32>
    %c13 = arith.constant 13 : index
    %c0_50 = arith.constant 0 : index
    %c0_51 = arith.constant 0 : index
    %110 = vector.load %arg1[%c13, %c0_50, %c0_51] : memref<20x4x1xf32, #tpu.memory_space<vmem>>, vector<1x4x1xf32>
    %111 = vector.shape_cast %110 : vector<1x4x1xf32> to vector<4x1xf32>
    %112 = vector.extract_strided_slice %102 {offsets = [0, 1, 0], sizes = [2, 1, 16], strides = [1, 1, 1]} : vector<2x4x16xf32> to vector<2x1x16xf32>
    %113 = vector.shape_cast %111 : vector<4x1xf32> to vector<1x4x1xf32>
    %114 = vector.broadcast %113 : vector<1x4x1xf32> to vector<2x4x16xf32>
    %115 = vector.broadcast %112 : vector<2x1x16xf32> to vector<2x4x16xf32>
    %116 = arith.mulf %114, %115 : vector<2x4x16xf32>
    %117 = arith.addf %109, %116 : vector<2x4x16xf32>
    %c14 = arith.constant 14 : index
    %c0_52 = arith.constant 0 : index
    %c0_53 = arith.constant 0 : index
    %118 = vector.load %arg1[%c14, %c0_52, %c0_53] : memref<20x4x1xf32, #tpu.memory_space<vmem>>, vector<1x4x1xf32>
    %119 = vector.shape_cast %118 : vector<1x4x1xf32> to vector<4x1xf32>
    %120 = vector.extract_strided_slice %102 {offsets = [0, 2, 0], sizes = [2, 1, 16], strides = [1, 1, 1]} : vector<2x4x16xf32> to vector<2x1x16xf32>
    %121 = vector.shape_cast %119 : vector<4x1xf32> to vector<1x4x1xf32>
    %122 = vector.broadcast %121 : vector<1x4x1xf32> to vector<2x4x16xf32>
    %123 = vector.broadcast %120 : vector<2x1x16xf32> to vector<2x4x16xf32>
    %124 = arith.mulf %122, %123 : vector<2x4x16xf32>
    %125 = arith.addf %117, %124 : vector<2x4x16xf32>
    %c15 = arith.constant 15 : index
    %c0_54 = arith.constant 0 : index
    %c0_55 = arith.constant 0 : index
    %126 = vector.load %arg1[%c15, %c0_54, %c0_55] : memref<20x4x1xf32, #tpu.memory_space<vmem>>, vector<1x4x1xf32>
    %127 = vector.shape_cast %126 : vector<1x4x1xf32> to vector<4x1xf32>
    %128 = vector.extract_strided_slice %102 {offsets = [0, 3, 0], sizes = [2, 1, 16], strides = [1, 1, 1]} : vector<2x4x16xf32> to vector<2x1x16xf32>
    %129 = vector.shape_cast %127 : vector<4x1xf32> to vector<1x4x1xf32>
    %130 = vector.broadcast %129 : vector<1x4x1xf32> to vector<2x4x16xf32>
    %131 = vector.broadcast %128 : vector<2x1x16xf32> to vector<2x4x16xf32>
    %132 = arith.mulf %130, %131 : vector<2x4x16xf32>
    %133 = arith.addf %125, %132 : vector<2x4x16xf32>
    %c0_56 = arith.constant 0 : index
    %c0_57 = arith.constant 0 : index
    %c4_58 = arith.constant 4 : index
    %134 = vector.load %arg6[%c0_56, %c0_57, %c4_58] : memref<2x4x20xf32, #tpu.memory_space<vmem>>, vector<2x4x16xf32>
    %c16 = arith.constant 16 : index
    %c0_59 = arith.constant 0 : index
    %c0_60 = arith.constant 0 : index
    %135 = vector.load %arg1[%c16, %c0_59, %c0_60] : memref<20x4x1xf32, #tpu.memory_space<vmem>>, vector<1x4x1xf32>
    %136 = vector.shape_cast %135 : vector<1x4x1xf32> to vector<4x1xf32>
    %137 = vector.extract_strided_slice %134 {offsets = [0, 0, 0], sizes = [2, 1, 16], strides = [1, 1, 1]} : vector<2x4x16xf32> to vector<2x1x16xf32>
    %138 = vector.shape_cast %136 : vector<4x1xf32> to vector<1x4x1xf32>
    %139 = vector.broadcast %138 : vector<1x4x1xf32> to vector<2x4x16xf32>
    %140 = vector.broadcast %137 : vector<2x1x16xf32> to vector<2x4x16xf32>
    %141 = arith.mulf %139, %140 : vector<2x4x16xf32>
    %c17 = arith.constant 17 : index
    %c0_61 = arith.constant 0 : index
    %c0_62 = arith.constant 0 : index
    %142 = vector.load %arg1[%c17, %c0_61, %c0_62] : memref<20x4x1xf32, #tpu.memory_space<vmem>>, vector<1x4x1xf32>
    %143 = vector.shape_cast %142 : vector<1x4x1xf32> to vector<4x1xf32>
    %144 = vector.extract_strided_slice %134 {offsets = [0, 1, 0], sizes = [2, 1, 16], strides = [1, 1, 1]} : vector<2x4x16xf32> to vector<2x1x16xf32>
    %145 = vector.shape_cast %143 : vector<4x1xf32> to vector<1x4x1xf32>
    %146 = vector.broadcast %145 : vector<1x4x1xf32> to vector<2x4x16xf32>
    %147 = vector.broadcast %144 : vector<2x1x16xf32> to vector<2x4x16xf32>
    %148 = arith.mulf %146, %147 : vector<2x4x16xf32>
    %149 = arith.addf %141, %148 : vector<2x4x16xf32>
    %c18_63 = arith.constant 18 : index
    %c0_64 = arith.constant 0 : index
    %c0_65 = arith.constant 0 : index
    %150 = vector.load %arg1[%c18_63, %c0_64, %c0_65] : memref<20x4x1xf32, #tpu.memory_space<vmem>>, vector<1x4x1xf32>
    %151 = vector.shape_cast %150 : vector<1x4x1xf32> to vector<4x1xf32>
    %152 = vector.extract_strided_slice %134 {offsets = [0, 2, 0], sizes = [2, 1, 16], strides = [1, 1, 1]} : vector<2x4x16xf32> to vector<2x1x16xf32>
    %153 = vector.shape_cast %151 : vector<4x1xf32> to vector<1x4x1xf32>
    %154 = vector.broadcast %153 : vector<1x4x1xf32> to vector<2x4x16xf32>
    %155 = vector.broadcast %152 : vector<2x1x16xf32> to vector<2x4x16xf32>
    %156 = arith.mulf %154, %155 : vector<2x4x16xf32>
    %157 = arith.addf %149, %156 : vector<2x4x16xf32>
    %c19 = arith.constant 19 : index
    %c0_66 = arith.constant 0 : index
    %c0_67 = arith.constant 0 : index
    %158 = vector.load %arg1[%c19, %c0_66, %c0_67] : memref<20x4x1xf32, #tpu.memory_space<vmem>>, vector<1x4x1xf32>
    %159 = vector.shape_cast %158 : vector<1x4x1xf32> to vector<4x1xf32>
    %160 = vector.extract_strided_slice %134 {offsets = [0, 3, 0], sizes = [2, 1, 16], strides = [1, 1, 1]} : vector<2x4x16xf32> to vector<2x1x16xf32>
    %161 = vector.shape_cast %159 : vector<4x1xf32> to vector<1x4x1xf32>
    %162 = vector.broadcast %161 : vector<1x4x1xf32> to vector<2x4x16xf32>
    %163 = vector.broadcast %160 : vector<2x1x16xf32> to vector<2x4x16xf32>
    %164 = arith.mulf %162, %163 : vector<2x4x16xf32>
    %165 = arith.addf %157, %164 : vector<2x4x16xf32>
    %166 = arith.addf %37, %69 : vector<2x4x16xf32>
    %167 = arith.addf %101, %133 : vector<2x4x16xf32>
    %168 = arith.addf %166, %167 : vector<2x4x16xf32>
    %169 = arith.addf %168, %165 : vector<2x4x16xf32>
    %cst_68 = arith.constant dense<0.000000e+00> : vector<4x16xf32>
    %170 = vector.multi_reduction <add>, %169, %cst_68 [0] : vector<2x4x16xf32> to vector<4x16xf32>
    %cst_69 = arith.constant dense<0.000000e+00> : vector<4xf32>
    %171 = vector.multi_reduction <add>, %170, %cst_69 [1] : vector<4x16xf32> to vector<4xf32>
    %172 = vector.shape_cast %171 : vector<4xf32> to vector<4x1xf32>
    %cst_70 = arith.constant 3.125000e-02 : f32
    %173 = vector.broadcast %cst_70 : f32 to vector<4x1xf32>
    %174 = arith.mulf %172, %173 : vector<4x1xf32>
    %175 = vector.shape_cast %174 : vector<4x1xf32> to vector<1x4x1xf32>
    %176 = vector.broadcast %175 : vector<1x4x1xf32> to vector<2x4x16xf32>
    %177 = arith.subf %169, %176 : vector<2x4x16xf32>
    %178 = arith.mulf %177, %177 : vector<2x4x16xf32>
    %cst_71 = arith.constant dense<0.000000e+00> : vector<4x16xf32>
    %179 = vector.multi_reduction <add>, %178, %cst_71 [0] : vector<2x4x16xf32> to vector<4x16xf32>
    %cst_72 = arith.constant dense<0.000000e+00> : vector<4xf32>
    %180 = vector.multi_reduction <add>, %179, %cst_72 [1] : vector<4x16xf32> to vector<4xf32>
    %181 = vector.shape_cast %180 : vector<4xf32> to vector<4x1xf32>
    %cst_73 = arith.constant 3.125000e-02 : f32
    %182 = vector.broadcast %cst_73 : f32 to vector<4x1xf32>
    %183 = arith.mulf %181, %182 : vector<4x1xf32>
    %c0_74 = arith.constant 0 : index
    %c0_75 = arith.constant 0 : index
    %184 = vector.load %arg3[%c0_74, %c0_75] : memref<4x1xf32, #tpu.memory_space<vmem>>, vector<4x1xf32>
    %cst_76 = arith.constant 9.99999974E-6 : f32
    %185 = vector.broadcast %cst_76 : f32 to vector<4x1xf32>
    %186 = arith.addf %183, %185 : vector<4x1xf32>
    %187 = math.rsqrt %186 : vector<4x1xf32>
    %188 = arith.mulf %184, %187 : vector<4x1xf32>
    %189 = vector.shape_cast %188 : vector<4x1xf32> to vector<1x4x1xf32>
    %190 = vector.broadcast %189 : vector<1x4x1xf32> to vector<2x4x16xf32>
    %191 = arith.mulf %177, %190 : vector<2x4x16xf32>
    %c0_77 = arith.constant 0 : index
    %c0_78 = arith.constant 0 : index
    %192 = vector.load %arg4[%c0_77, %c0_78] : memref<4x1xf32, #tpu.memory_space<vmem>>, vector<4x1xf32>
    %193 = vector.shape_cast %192 : vector<4x1xf32> to vector<1x4x1xf32>
    %194 = vector.broadcast %193 : vector<1x4x1xf32> to vector<2x4x16xf32>
    %195 = arith.addf %191, %194 : vector<2x4x16xf32>
    %196 = math.tanh %195 : vector<2x4x16xf32>
    %c0_79 = arith.constant 0 : index
    %c0_80 = arith.constant 0 : index
    %c2_81 = arith.constant 2 : index
    %197 = vector.load %arg6[%c0_79, %c0_80, %c2_81] : memref<2x4x20xf32, #tpu.memory_space<vmem>>, vector<2x4x16xf32>
    tpu.vector_store %arg6[%c0_79, %c0_80, %c2_81], %196 {strides = array<i32>} : memref<2x4x20xf32, #tpu.memory_space<vmem>>, vector<2x4x16xf32>,
    %c0_82 = arith.constant 0 : index
    %c0_83 = arith.constant 0 : index
    %c0_84 = arith.constant 0 : index
    %198 = vector.load %arg6[%c0_82, %c0_83, %c0_84] : memref<2x4x20xf32, #tpu.memory_space<vmem>>, vector<2x4x16xf32>
    %c0_85 = arith.constant 0 : index
    %c0_86 = arith.constant 0 : index
    %c0_87 = arith.constant 0 : index
    %199 = vector.load %arg2[%c0_85, %c0_86, %c0_87] : memref<20x4x1xf32, #tpu.memory_space<vmem>>, vector<1x4x1xf32>
    %200 = vector.shape_cast %199 : vector<1x4x1xf32> to vector<4x1xf32>
    %201 = vector.extract_strided_slice %198 {offsets = [0, 0, 0], sizes = [2, 1, 16], strides = [1, 1, 1]} : vector<2x4x16xf32> to vector<2x1x16xf32>
    %202 = vector.shape_cast %200 : vector<4x1xf32> to vector<1x4x1xf32>
    %203 = vector.broadcast %202 : vector<1x4x1xf32> to vector<2x4x16xf32>
    %204 = vector.broadcast %201 : vector<2x1x16xf32> to vector<2x4x16xf32>
    %205 = arith.mulf %203, %204 : vector<2x4x16xf32>
    %c1_88 = arith.constant 1 : index
    %c0_89 = arith.constant 0 : index
    %c0_90 = arith.constant 0 : index
    %206 = vector.load %arg2[%c1_88, %c0_89, %c0_90] : memref<20x4x1xf32, #tpu.memory_space<vmem>>, vector<1x4x1xf32>
    %207 = vector.shape_cast %206 : vector<1x4x1xf32> to vector<4x1xf32>
    %208 = vector.extract_strided_slice %198 {offsets = [0, 1, 0], sizes = [2, 1, 16], strides = [1, 1, 1]} : vector<2x4x16xf32> to vector<2x1x16xf32>
    %209 = vector.shape_cast %207 : vector<4x1xf32> to vector<1x4x1xf32>
    %210 = vector.broadcast %209 : vector<1x4x1xf32> to vector<2x4x16xf32>
    %211 = vector.broadcast %208 : vector<2x1x16xf32> to vector<2x4x16xf32>
    %212 = arith.mulf %210, %211 : vector<2x4x16xf32>
    %213 = arith.addf %205, %212 : vector<2x4x16xf32>
    %c2_91 = arith.constant 2 : index
    %c0_92 = arith.constant 0 : index
    %c0_93 = arith.constant 0 : index
    %214 = vector.load %arg2[%c2_91, %c0_92, %c0_93] : memref<20x4x1xf32, #tpu.memory_space<vmem>>, vector<1x4x1xf32>
    %215 = vector.shape_cast %214 : vector<1x4x1xf32> to vector<4x1xf32>
    %216 = vector.extract_strided_slice %198 {offsets = [0, 2, 0], sizes = [2, 1, 16], strides = [1, 1, 1]} : vector<2x4x16xf32> to vector<2x1x16xf32>
    %217 = vector.shape_cast %215 : vector<4x1xf32> to vector<1x4x1xf32>
    %218 = vector.broadcast %217 : vector<1x4x1xf32> to vector<2x4x16xf32>
    %219 = vector.broadcast %216 : vector<2x1x16xf32> to vector<2x4x16xf32>
    %220 = arith.mulf %218, %219 : vector<2x4x16xf32>
    %221 = arith.addf %213, %220 : vector<2x4x16xf32>
    %c3_94 = arith.constant 3 : index
    %c0_95 = arith.constant 0 : index
    %c0_96 = arith.constant 0 : index
    %222 = vector.load %arg2[%c3_94, %c0_95, %c0_96] : memref<20x4x1xf32, #tpu.memory_space<vmem>>, vector<1x4x1xf32>
    %223 = vector.shape_cast %222 : vector<1x4x1xf32> to vector<4x1xf32>
    %224 = vector.extract_strided_slice %198 {offsets = [0, 3, 0], sizes = [2, 1, 16], strides = [1, 1, 1]} : vector<2x4x16xf32> to vector<2x1x16xf32>
    %225 = vector.shape_cast %223 : vector<4x1xf32> to vector<1x4x1xf32>
    %226 = vector.broadcast %225 : vector<1x4x1xf32> to vector<2x4x16xf32>
    %227 = vector.broadcast %224 : vector<2x1x16xf32> to vector<2x4x16xf32>
    %228 = arith.mulf %226, %227 : vector<2x4x16xf32>
    %229 = arith.addf %221, %228 : vector<2x4x16xf32>
    %c0_97 = arith.constant 0 : index
    %c0_98 = arith.constant 0 : index
    %c1_99 = arith.constant 1 : index
    %230 = vector.load %arg6[%c0_97, %c0_98, %c1_99] : memref<2x4x20xf32, #tpu.memory_space<vmem>>, vector<2x4x16xf32>
    %c4_100 = arith.constant 4 : index
    %c0_101 = arith.constant 0 : index
    %c0_102 = arith.constant 0 : index
    %231 = vector.load %arg2[%c4_100, %c0_101, %c0_102] : memref<20x4x1xf32, #tpu.memory_space<vmem>>, vector<1x4x1xf32>
    %232 = vector.shape_cast %231 : vector<1x4x1xf32> to vector<4x1xf32>
    %233 = vector.extract_strided_slice %230 {offsets = [0, 0, 0], sizes = [2, 1, 16], strides = [1, 1, 1]} : vector<2x4x16xf32> to vector<2x1x16xf32>
    %234 = vector.shape_cast %232 : vector<4x1xf32> to vector<1x4x1xf32>
    %235 = vector.broadcast %234 : vector<1x4x1xf32> to vector<2x4x16xf32>
    %236 = vector.broadcast %233 : vector<2x1x16xf32> to vector<2x4x16xf32>
    %237 = arith.mulf %235, %236 : vector<2x4x16xf32>
    %c5_103 = arith.constant 5 : index
    %c0_104 = arith.constant 0 : index
    %c0_105 = arith.constant 0 : index
    %238 = vector.load %arg2[%c5_103, %c0_104, %c0_105] : memref<20x4x1xf32, #tpu.memory_space<vmem>>, vector<1x4x1xf32>
    %239 = vector.shape_cast %238 : vector<1x4x1xf32> to vector<4x1xf32>
    %240 = vector.extract_strided_slice %230 {offsets = [0, 1, 0], sizes = [2, 1, 16], strides = [1, 1, 1]} : vector<2x4x16xf32> to vector<2x1x16xf32>
    %241 = vector.shape_cast %239 : vector<4x1xf32> to vector<1x4x1xf32>
    %242 = vector.broadcast %241 : vector<1x4x1xf32> to vector<2x4x16xf32>
    %243 = vector.broadcast %240 : vector<2x1x16xf32> to vector<2x4x16xf32>
    %244 = arith.mulf %242, %243 : vector<2x4x16xf32>
    %245 = arith.addf %237, %244 : vector<2x4x16xf32>
    %c6_106 = arith.constant 6 : index
    %c0_107 = arith.constant 0 : index
    %c0_108 = arith.constant 0 : index
    %246 = vector.load %arg2[%c6_106, %c0_107, %c0_108] : memref<20x4x1xf32, #tpu.memory_space<vmem>>, vector<1x4x1xf32>
    %247 = vector.shape_cast %246 : vector<1x4x1xf32> to vector<4x1xf32>
    %248 = vector.extract_strided_slice %230 {offsets = [0, 2, 0], sizes = [2, 1, 16], strides = [1, 1, 1]} : vector<2x4x16xf32> to vector<2x1x16xf32>
    %249 = vector.shape_cast %247 : vector<4x1xf32> to vector<1x4x1xf32>
    %250 = vector.broadcast %249 : vector<1x4x1xf32> to vector<2x4x16xf32>
    %251 = vector.broadcast %248 : vector<2x1x16xf32> to vector<2x4x16xf32>
    %252 = arith.mulf %250, %251 : vector<2x4x16xf32>
    %253 = arith.addf %245, %252 : vector<2x4x16xf32>
    %c7_109 = arith.constant 7 : index
    %c0_110 = arith.constant 0 : index
    %c0_111 = arith.constant 0 : index
    %254 = vector.load %arg2[%c7_109, %c0_110, %c0_111] : memref<20x4x1xf32, #tpu.memory_space<vmem>>, vector<1x4x1xf32>
    %255 = vector.shape_cast %254 : vector<1x4x1xf32> to vector<4x1xf32>
    %256 = vector.extract_strided_slice %230 {offsets = [0, 3, 0], sizes = [2, 1, 16], strides = [1, 1, 1]} : vector<2x4x16xf32> to vector<2x1x16xf32>
    %257 = vector.shape_cast %255 : vector<4x1xf32> to vector<1x4x1xf32>
    %258 = vector.broadcast %257 : vector<1x4x1xf32> to vector<2x4x16xf32>
    %259 = vector.broadcast %256 : vector<2x1x16xf32> to vector<2x4x16xf32>
    %260 = arith.mulf %258, %259 : vector<2x4x16xf32>
    %261 = arith.addf %253, %260 : vector<2x4x16xf32>
    %c0_112 = arith.constant 0 : index
    %c0_113 = arith.constant 0 : index
    %c2_114 = arith.constant 2 : index
    %262 = vector.load %arg6[%c0_112, %c0_113, %c2_114] : memref<2x4x20xf32, #tpu.memory_space<vmem>>, vector<2x4x16xf32>
    %c8_115 = arith.constant 8 : index
    %c0_116 = arith.constant 0 : index
    %c0_117 = arith.constant 0 : index
    %263 = vector.load %arg2[%c8_115, %c0_116, %c0_117] : memref<20x4x1xf32, #tpu.memory_space<vmem>>, vector<1x4x1xf32>
    %264 = vector.shape_cast %263 : vector<1x4x1xf32> to vector<4x1xf32>
    %265 = vector.extract_strided_slice %262 {offsets = [0, 0, 0], sizes = [2, 1, 16], strides = [1, 1, 1]} : vector<2x4x16xf32> to vector<2x1x16xf32>
    %266 = vector.shape_cast %264 : vector<4x1xf32> to vector<1x4x1xf32>
    %267 = vector.broadcast %266 : vector<1x4x1xf32> to vector<2x4x16xf32>
    %268 = vector.broadcast %265 : vector<2x1x16xf32> to vector<2x4x16xf32>
    %269 = arith.mulf %267, %268 : vector<2x4x16xf32>
    %c9_118 = arith.constant 9 : index
    %c0_119 = arith.constant 0 : index
    %c0_120 = arith.constant 0 : index
    %270 = vector.load %arg2[%c9_118, %c0_119, %c0_120] : memref<20x4x1xf32, #tpu.memory_space<vmem>>, vector<1x4x1xf32>
    %271 = vector.shape_cast %270 : vector<1x4x1xf32> to vector<4x1xf32>
    %272 = vector.extract_strided_slice %262 {offsets = [0, 1, 0], sizes = [2, 1, 16], strides = [1, 1, 1]} : vector<2x4x16xf32> to vector<2x1x16xf32>
    %273 = vector.shape_cast %271 : vector<4x1xf32> to vector<1x4x1xf32>
    %274 = vector.broadcast %273 : vector<1x4x1xf32> to vector<2x4x16xf32>
    %275 = vector.broadcast %272 : vector<2x1x16xf32> to vector<2x4x16xf32>
    %276 = arith.mulf %274, %275 : vector<2x4x16xf32>
    %277 = arith.addf %269, %276 : vector<2x4x16xf32>
    %c10_121 = arith.constant 10 : index
    %c0_122 = arith.constant 0 : index
    %c0_123 = arith.constant 0 : index
    %278 = vector.load %arg2[%c10_121, %c0_122, %c0_123] : memref<20x4x1xf32, #tpu.memory_space<vmem>>, vector<1x4x1xf32>
    %279 = vector.shape_cast %278 : vector<1x4x1xf32> to vector<4x1xf32>
    %280 = vector.extract_strided_slice %262 {offsets = [0, 2, 0], sizes = [2, 1, 16], strides = [1, 1, 1]} : vector<2x4x16xf32> to vector<2x1x16xf32>
    %281 = vector.shape_cast %279 : vector<4x1xf32> to vector<1x4x1xf32>
    %282 = vector.broadcast %281 : vector<1x4x1xf32> to vector<2x4x16xf32>
    %283 = vector.broadcast %280 : vector<2x1x16xf32> to vector<2x4x16xf32>
    %284 = arith.mulf %282, %283 : vector<2x4x16xf32>
    %285 = arith.addf %277, %284 : vector<2x4x16xf32>
    %c11_124 = arith.constant 11 : index
    %c0_125 = arith.constant 0 : index
    %c0_126 = arith.constant 0 : index
    %286 = vector.load %arg2[%c11_124, %c0_125, %c0_126] : memref<20x4x1xf32, #tpu.memory_space<vmem>>, vector<1x4x1xf32>
    %287 = vector.shape_cast %286 : vector<1x4x1xf32> to vector<4x1xf32>
    %288 = vector.extract_strided_slice %262 {offsets = [0, 3, 0], sizes = [2, 1, 16], strides = [1, 1, 1]} : vector<2x4x16xf32> to vector<2x1x16xf32>
    %289 = vector.shape_cast %287 : vector<4x1xf32> to vector<1x4x1xf32>
    %290 = vector.broadcast %289 : vector<1x4x1xf32> to vector<2x4x16xf32>
    %291 = vector.broadcast %288 : vector<2x1x16xf32> to vector<2x4x16xf32>
    %292 = arith.mulf %290, %291 : vector<2x4x16xf32>
    %293 = arith.addf %285, %292 : vector<2x4x16xf32>
    %c0_127 = arith.constant 0 : index
    %c0_128 = arith.constant 0 : index
    %c3_129 = arith.constant 3 : index
    %294 = vector.load %arg6[%c0_127, %c0_128, %c3_129] : memref<2x4x20xf32, #tpu.memory_space<vmem>>, vector<2x4x16xf32>
    %c12_130 = arith.constant 12 : index
    %c0_131 = arith.constant 0 : index
    %c0_132 = arith.constant 0 : index
    %295 = vector.load %arg2[%c12_130, %c0_131, %c0_132] : memref<20x4x1xf32, #tpu.memory_space<vmem>>, vector<1x4x1xf32>
    %296 = vector.shape_cast %295 : vector<1x4x1xf32> to vector<4x1xf32>
    %297 = vector.extract_strided_slice %294 {offsets = [0, 0, 0], sizes = [2, 1, 16], strides = [1, 1, 1]} : vector<2x4x16xf32> to vector<2x1x16xf32>
    %298 = vector.shape_cast %296 : vector<4x1xf32> to vector<1x4x1xf32>
    %299 = vector.broadcast %298 : vector<1x4x1xf32> to vector<2x4x16xf32>
    %300 = vector.broadcast %297 : vector<2x1x16xf32> to vector<2x4x16xf32>
    %301 = arith.mulf %299, %300 : vector<2x4x16xf32>
    %c13_133 = arith.constant 13 : index
    %c0_134 = arith.constant 0 : index
    %c0_135 = arith.constant 0 : index
    %302 = vector.load %arg2[%c13_133, %c0_134, %c0_135] : memref<20x4x1xf32, #tpu.memory_space<vmem>>, vector<1x4x1xf32>
    %303 = vector.shape_cast %302 : vector<1x4x1xf32> to vector<4x1xf32>
    %304 = vector.extract_strided_slice %294 {offsets = [0, 1, 0], sizes = [2, 1, 16], strides = [1, 1, 1]} : vector<2x4x16xf32> to vector<2x1x16xf32>
    %305 = vector.shape_cast %303 : vector<4x1xf32> to vector<1x4x1xf32>
    %306 = vector.broadcast %305 : vector<1x4x1xf32> to vector<2x4x16xf32>
    %307 = vector.broadcast %304 : vector<2x1x16xf32> to vector<2x4x16xf32>
    %308 = arith.mulf %306, %307 : vector<2x4x16xf32>
    %309 = arith.addf %301, %308 : vector<2x4x16xf32>
    %c14_136 = arith.constant 14 : index
    %c0_137 = arith.constant 0 : index
    %c0_138 = arith.constant 0 : index
    %310 = vector.load %arg2[%c14_136, %c0_137, %c0_138] : memref<20x4x1xf32, #tpu.memory_space<vmem>>, vector<1x4x1xf32>
    %311 = vector.shape_cast %310 : vector<1x4x1xf32> to vector<4x1xf32>
    %312 = vector.extract_strided_slice %294 {offsets = [0, 2, 0], sizes = [2, 1, 16], strides = [1, 1, 1]} : vector<2x4x16xf32> to vector<2x1x16xf32>
    %313 = vector.shape_cast %311 : vector<4x1xf32> to vector<1x4x1xf32>
    %314 = vector.broadcast %313 : vector<1x4x1xf32> to vector<2x4x16xf32>
    %315 = vector.broadcast %312 : vector<2x1x16xf32> to vector<2x4x16xf32>
    %316 = arith.mulf %314, %315 : vector<2x4x16xf32>
    %317 = arith.addf %309, %316 : vector<2x4x16xf32>
    %c15_139 = arith.constant 15 : index
    %c0_140 = arith.constant 0 : index
    %c0_141 = arith.constant 0 : index
    %318 = vector.load %arg2[%c15_139, %c0_140, %c0_141] : memref<20x4x1xf32, #tpu.memory_space<vmem>>, vector<1x4x1xf32>
    %319 = vector.shape_cast %318 : vector<1x4x1xf32> to vector<4x1xf32>
    %320 = vector.extract_strided_slice %294 {offsets = [0, 3, 0], sizes = [2, 1, 16], strides = [1, 1, 1]} : vector<2x4x16xf32> to vector<2x1x16xf32>
    %321 = vector.shape_cast %319 : vector<4x1xf32> to vector<1x4x1xf32>
    %322 = vector.broadcast %321 : vector<1x4x1xf32> to vector<2x4x16xf32>
    %323 = vector.broadcast %320 : vector<2x1x16xf32> to vector<2x4x16xf32>
    %324 = arith.mulf %322, %323 : vector<2x4x16xf32>
    %325 = arith.addf %317, %324 : vector<2x4x16xf32>
    %c0_142 = arith.constant 0 : index
    %c0_143 = arith.constant 0 : index
    %c4_144 = arith.constant 4 : index
    %326 = vector.load %arg6[%c0_142, %c0_143, %c4_144] : memref<2x4x20xf32, #tpu.memory_space<vmem>>, vector<2x4x16xf32>
    %c16_145 = arith.constant 16 : index
    %c0_146 = arith.constant 0 : index
    %c0_147 = arith.constant 0 : index
    %327 = vector.load %arg2[%c16_145, %c0_146, %c0_147] : memref<20x4x1xf32, #tpu.memory_space<vmem>>, vector<1x4x1xf32>
    %328 = vector.shape_cast %327 : vector<1x4x1xf32> to vector<4x1xf32>
    %329 = vector.extract_strided_slice %326 {offsets = [0, 0, 0], sizes = [2, 1, 16], strides = [1, 1, 1]} : vector<2x4x16xf32> to vector<2x1x16xf32>
    %330 = vector.shape_cast %328 : vector<4x1xf32> to vector<1x4x1xf32>
    %331 = vector.broadcast %330 : vector<1x4x1xf32> to vector<2x4x16xf32>
    %332 = vector.broadcast %329 : vector<2x1x16xf32> to vector<2x4x16xf32>
    %333 = arith.mulf %331, %332 : vector<2x4x16xf32>
    %c17_148 = arith.constant 17 : index
    %c0_149 = arith.constant 0 : index
    %c0_150 = arith.constant 0 : index
    %334 = vector.load %arg2[%c17_148, %c0_149, %c0_150] : memref<20x4x1xf32, #tpu.memory_space<vmem>>, vector<1x4x1xf32>
    %335 = vector.shape_cast %334 : vector<1x4x1xf32> to vector<4x1xf32>
    %336 = vector.extract_strided_slice %326 {offsets = [0, 1, 0], sizes = [2, 1, 16], strides = [1, 1, 1]} : vector<2x4x16xf32> to vector<2x1x16xf32>
    %337 = vector.shape_cast %335 : vector<4x1xf32> to vector<1x4x1xf32>
    %338 = vector.broadcast %337 : vector<1x4x1xf32> to vector<2x4x16xf32>
    %339 = vector.broadcast %336 : vector<2x1x16xf32> to vector<2x4x16xf32>
    %340 = arith.mulf %338, %339 : vector<2x4x16xf32>
    %341 = arith.addf %333, %340 : vector<2x4x16xf32>
    %c18_151 = arith.constant 18 : index
    %c0_152 = arith.constant 0 : index
    %c0_153 = arith.constant 0 : index
    %342 = vector.load %arg2[%c18_151, %c0_152, %c0_153] : memref<20x4x1xf32, #tpu.memory_space<vmem>>, vector<1x4x1xf32>
    %343 = vector.shape_cast %342 : vector<1x4x1xf32> to vector<4x1xf32>
    %344 = vector.extract_strided_slice %326 {offsets = [0, 2, 0], sizes = [2, 1, 16], strides = [1, 1, 1]} : vector<2x4x16xf32> to vector<2x1x16xf32>
    %345 = vector.shape_cast %343 : vector<4x1xf32> to vector<1x4x1xf32>
    %346 = vector.broadcast %345 : vector<1x4x1xf32> to vector<2x4x16xf32>
    %347 = vector.broadcast %344 : vector<2x1x16xf32> to vector<2x4x16xf32>
    %348 = arith.mulf %346, %347 : vector<2x4x16xf32>
    %349 = arith.addf %341, %348 : vector<2x4x16xf32>
    %c19_154 = arith.constant 19 : index
    %c0_155 = arith.constant 0 : index
    %c0_156 = arith.constant 0 : index
    %350 = vector.load %arg2[%c19_154, %c0_155, %c0_156] : memref<20x4x1xf32, #tpu.memory_space<vmem>>, vector<1x4x1xf32>
    %351 = vector.shape_cast %350 : vector<1x4x1xf32> to vector<4x1xf32>
    %352 = vector.extract_strided_slice %326 {offsets = [0, 3, 0], sizes = [2, 1, 16], strides = [1, 1, 1]} : vector<2x4x16xf32> to vector<2x1x16xf32>
    %353 = vector.shape_cast %351 : vector<4x1xf32> to vector<1x4x1xf32>
    %354 = vector.broadcast %353 : vector<1x4x1xf32> to vector<2x4x16xf32>
    %355 = vector.broadcast %352 : vector<2x1x16xf32> to vector<2x4x16xf32>
    %356 = arith.mulf %354, %355 : vector<2x4x16xf32>
    %357 = arith.addf %349, %356 : vector<2x4x16xf32>
    %358 = arith.addf %229, %261 : vector<2x4x16xf32>
    %359 = arith.addf %293, %325 : vector<2x4x16xf32>
    %360 = arith.addf %358, %359 : vector<2x4x16xf32>
    %361 = arith.addf %360, %357 : vector<2x4x16xf32>
    %cst_157 = arith.constant dense<0.000000e+00> : vector<4x16xf32>
    %362 = vector.multi_reduction <add>, %361, %cst_157 [0] : vector<2x4x16xf32> to vector<4x16xf32>
    %cst_158 = arith.constant dense<0.000000e+00> : vector<4xf32>
    %363 = vector.multi_reduction <add>, %362, %cst_158 [1] : vector<4x16xf32> to vector<4xf32>
    %364 = vector.shape_cast %363 : vector<4xf32> to vector<4x1xf32>
    %cst_159 = arith.constant 3.125000e-02 : f32
    %365 = vector.broadcast %cst_159 : f32 to vector<4x1xf32>
    %366 = arith.mulf %364, %365 : vector<4x1xf32>
    %367 = vector.shape_cast %366 : vector<4x1xf32> to vector<1x4x1xf32>
    %368 = vector.broadcast %367 : vector<1x4x1xf32> to vector<2x4x16xf32>
    %369 = arith.subf %361, %368 : vector<2x4x16xf32>
    %370 = arith.mulf %369, %369 : vector<2x4x16xf32>
    %cst_160 = arith.constant dense<0.000000e+00> : vector<4x16xf32>
    %371 = vector.multi_reduction <add>, %370, %cst_160 [0] : vector<2x4x16xf32> to vector<4x16xf32>
    %cst_161 = arith.constant dense<0.000000e+00> : vector<4xf32>
    %372 = vector.multi_reduction <add>, %371, %cst_161 [1] : vector<4x16xf32> to vector<4xf32>
    %373 = vector.shape_cast %372 : vector<4xf32> to vector<4x1xf32>
    %cst_162 = arith.constant 3.125000e-02 : f32
    %374 = vector.broadcast %cst_162 : f32 to vector<4x1xf32>
    %375 = arith.mulf %373, %374 : vector<4x1xf32>
    %c0_163 = arith.constant 0 : index
    %c0_164 = arith.constant 0 : index
    %376 = vector.load %arg3[%c0_163, %c0_164] : memref<4x1xf32, #tpu.memory_space<vmem>>, vector<4x1xf32>
    %cst_165 = arith.constant 9.99999974E-6 : f32
    %377 = vector.broadcast %cst_165 : f32 to vector<4x1xf32>
    %378 = arith.addf %375, %377 : vector<4x1xf32>
    %379 = math.rsqrt %378 : vector<4x1xf32>
    %380 = arith.mulf %376, %379 : vector<4x1xf32>
    %381 = vector.shape_cast %380 : vector<4x1xf32> to vector<1x4x1xf32>
    %382 = vector.broadcast %381 : vector<1x4x1xf32> to vector<2x4x16xf32>
    %383 = arith.mulf %369, %382 : vector<2x4x16xf32>
    %c0_166 = arith.constant 0 : index
    %c0_167 = arith.constant 0 : index
    %384 = vector.load %arg4[%c0_166, %c0_167] : memref<4x1xf32, #tpu.memory_space<vmem>>, vector<4x1xf32>
    %385 = vector.shape_cast %384 : vector<4x1xf32> to vector<1x4x1xf32>
    %386 = vector.broadcast %385 : vector<1x4x1xf32> to vector<2x4x16xf32>
    %387 = arith.addf %383, %386 : vector<2x4x16xf32>
    %c0_168 = arith.constant 0 : index
    %c0_169 = arith.constant 0 : index
    %c0_170 = arith.constant 0 : index
    %388 = vector.load %arg0[%c0_168, %c0_169, %c0_170] : memref<2x4x16xf32, #tpu.memory_space<vmem>>, vector<2x4x16xf32>
    %389 = arith.addf %387, %388 : vector<2x4x16xf32>
    %390 = math.tanh %389 : vector<2x4x16xf32>
    %c0_171 = arith.constant 0 : index
    %c0_172 = arith.constant 0 : index
    %c0_173 = arith.constant 0 : index
    %391 = vector.load %arg5[%c0_171, %c0_172, %c0_173] : memref<2x4x16xf32, #tpu.memory_space<vmem>>, vector<2x4x16xf32>
    tpu.vector_store %arg5[%c0_171, %c0_172, %c0_173], %390 {strides = array<i32>} : memref<2x4x16xf32, #tpu.memory_space<vmem>>, vector<2x4x16xf32>,
    return
  }
}

</mosaic_0001>

<bundles_post_ra>
// kernel: tpu_custom_call.1
= control target key start
LH: loop header
LB: loop body
LE: loop exit
PB: predicated region body
PF: predicated region fallthrough
CT: control target
= control target key end

     0   :  { %v802_v2 = vmov 0   ;;  %s803_s22 = smov 2   ;;  %vm21_vm0 = vcmask 11264   ;;  %vm24_vm1 = vcmask 158864   ;;  %v804_v7 = vmov 0.0   ;;  %s1171_s0 = inlined_call_operand.vmem [shape: f32[2,4,16], index: 0, kind: input, shape index: {}]   ;;  %s1172_s1 = inlined_call_operand.vmem [shape: f32[20,4,1], index: 1, kind: input, shape index: {}]   ;;  %s1173_s2 = inlined_call_operand.vmem [shape: f32[20,4,1], index: 2, kind: input, shape index: {}]   ;;  %s1174_s3 = inlined_call_operand.vmem [shape: f32[4,1], index: 3, kind: input, shape index: {}]   ;;  %s1175_s4 = inlined_call_operand.vmem [shape: f32[4,1], index: 4, kind: input, shape index: {}]   ;;  %s1176_s5 = inlined_call_operand.hbm [shape: f32[2,4,16], index: 5, kind: output, shape index: {}]  }
   0x1   :  { %v27_v0 = vld [vmem:[%s1171_s0] sm:$0xf]  ;;  %v728_v1 = vld [vmem:[%s1172_s1 + $0x30] sm:$0xf]  ;;  %764 = vset.pattern.permute.xlu1 %v802_v2  ;;  %v28_v3 = vld [vmem:[%s1171_s0 + $0x4] sm:$0xf]  ;;  %765 = vset.pattern.permute.xlu0 %v802_v2 }
   0x2   :  { %31 = vrot.lane.b32.xlu0 %v27_v0, %s803_s22  ;;  %203 = vperm.xlu1 %764, %v728_v1   ;;  %v729_v4 = vld [vmem:[%s1172_s1 + $0x34] sm:$0xf]  ;;  %v730_v5 = vld [vmem:[%s1172_s1 + $0x38] sm:$0xf]  ;;  %v731_v6 = vld [vmem:[%s1172_s1 + $0x3c] sm:$0xf] }
   0x3   :  { %22 = vst.msk [vmem:[#allocation2] sm:$0xf] %vm21_vm0, %v804_v7  ;;  %23 = vst.msk [vmem:[#allocation2 + $0x4] sm:$0xf] %vm21_vm0, %v804_v7 }
   0x6   :  { %33 = vrot.lane.b32.xlu0 %v28_v3, %s803_s22  ;;  %212 = vperm.xlu1 %764, %v729_v4  }
   0x7   :  { %10 = vsyncpa [#allocation4], 0  ;;  %25 = vst.msk [vmem:[#allocation2] sm:$0xf] %vm24_vm1, %v804_v7  ;;  %v721_v8 = vld [vmem:[%s1172_s1 + $0x14] sm:$0xf]  ;;  %v48_v22 = vlaneseq }
   0x8   :  { %26 = vst.msk [vmem:[#allocation2 + $0x4] sm:$0xf] %vm24_vm1, %v804_v7  ;;  %v720_v9 = vld [vmem:[%s1172_s1 + $0x10] sm:$0xf]  ;;  %v725_v10 = vld [vmem:[%s1172_s1 + $0x24] sm:$0xf] }
   0x9   :  { %v724_v11 = vld [vmem:[%s1172_s1 + $0x20] sm:$0xf]  ;;  %v726_v12 = vld [vmem:[%s1172_s1 + $0x28] sm:$0xf]  ;;  %v722_v13 = vld [vmem:[%s1172_s1 + $0x18] sm:$0xf] }
   0xa   :  { %223 = vperm.xlu0 %765, %v730_v5   ;;  %234 = vperm.xlu1 %764, %v731_v6   ;;  %v727_v14 = vld [vmem:[%s1172_s1 + $0x2c] sm:$0xf]  ;;  %v723_v15 = vld [vmem:[%s1172_s1 + $0x1c] sm:$0xf]  ;;  %v733_v16 = vld [vmem:[%s1172_s1 + $0x44] sm:$0xf] }
   0xb   :  { %v732_v17 = vld [vmem:[%s1172_s1 + $0x40] sm:$0xf]  ;;  %v735_v18 = vld [vmem:[%s1172_s1 + $0x4c] sm:$0xf]  ;;  %v734_v19 = vld [vmem:[%s1172_s1 + $0x48] sm:$0xf] }
   0xc   :  { %vm37_vm2 = vcmask 142352   ;;  %v49_v23 = vshrl.u32 %v48_v22, 7  ;;  %s805_s6 = smov 127   ;;  %v717_v57 = vld [vmem:[%s1172_s1 + $0x4] sm:$0xf]  ;;  %s807_s15 = smov 124  }
   0xd   :  { %v42_v58 = vld [vmem:[%s1172_s1] sm:$0xf]  ;;  %v719_v1 = vld [vmem:[%s1172_s1 + $0xc] sm:$0xf]  ;;  %v718_v2 = vld [vmem:[%s1172_s1 + $0x8] sm:$0xf] }
   0xe   :  { %128 = vperm.xlu0 %765, %v721_v8   ;;  %119 = vperm.xlu1 %764, %v720_v9   ;;  %v899_v25 = vsub.s32 0, %v49_v23  ;;  %v901_v26 = vsub.s32 1, %v49_v23  ;;  %v906_v30 = vsub.s32 2, %v49_v23  ;;  %v917_v34 = vsub.s32 3, %v49_v23  ;;  %s806_s1 = smov 126  }
   0xf   :  { %vm323_vm3 = vcmask 125952  }
  0x12   :  { %170 = vperm.xlu0 %765, %v725_v10   ;;  %161 = vperm.xlu1 %764, %v724_v11  }
  0x16   :  { %181 = vperm.xlu0 %765, %v726_v12   ;;  %139 = vperm.xlu1 %764, %v722_v13  }
  0x1a   :  { %192 = vperm.xlu0 %765, %v727_v14   ;;  %150 = vperm.xlu1 %764, %v723_v15  }
  0x1e   :  { %254 = vperm.xlu0 %765, %v733_v16   ;;  %245 = vperm.xlu1 %764, %v732_v17  }
  0x22   :  { %276 = vperm.xlu0 %765, %v735_v18   ;;  %265 = vperm.xlu1 %764, %v734_v19  }
  0x74   :  { %v32_v20 = vpop.permute.xlu0 %31 }
  0x75   :  { %38 = vst.msk [vmem:[#allocation2] sm:$0xf] %vm37_vm2, %v32_v20 }
  0x78   :  { %v34_v21 = vpop.permute.xlu0 %33 }
  0x79   :  { %39 = vst.msk [vmem:[#allocation2 + $0x4] sm:$0xf] %vm37_vm2, %v34_v21 }
  0x7c   :  { %v40_v28 = vld [vmem:[#allocation2] sm:$0xf] }
  0x7d   :  { %v909_v31 = vrot.slane %v40_v28, %v899_v25  ;;  %v912_v32 = vrot.slane %v40_v28, %v901_v26  ;;  %v924_v40 = vrot.slane %v40_v28, %v906_v30  ;;  %v930_v45 = vrot.slane %v40_v28, %v917_v34 }
  0x80   :  { %v41_v24 = vld [vmem:[#allocation2 + $0x4] sm:$0xf] }
  0x81   :  { %v204_v27 = vpop.permute.xlu1 %203  ;;  %v904_v29 = vrot.slane %v41_v24, %v899_v25  ;;  %v915_v33 = vrot.slane %v41_v24, %v901_v26  ;;  %v927_v41 = vrot.slane %v41_v24, %v906_v30  ;;  %v933_v46 = vrot.slane %v41_v24, %v917_v34 }
  0x82   :  { %v206_v36 = vmul.f32 %v204_v27, %v909_v31 }
  0x83   :  { %v207_v37 = vmul.f32 %v204_v27, %v904_v29 }
  0x85   :  { %v213_v35 = vpop.permute.xlu1 %212 }
  0x86   :  { %v215_v38 = vmul.f32 %v213_v35, %v912_v32  ;;  %v216_v39 = vmul.f32 %v213_v35, %v915_v33 }
  0x88   :  { %v217_v42 = vadd.f32 %v215_v38, %v206_v36  ;;  %v218_v43 = vadd.f32 %v216_v39, %v207_v37 }
  0x89   :  { %v224_v44 = vpop.permute.xlu0 %223  ;;  %v235_v49 = vpop.permute.xlu1 %234 }
  0x8a   :  { %v226_v47 = vmul.f32 %v224_v44, %v924_v40  ;;  %v227_v48 = vmul.f32 %v224_v44, %v927_v41  ;;  %v237_v50 = vmul.f32 %v235_v49, %v930_v45  ;;  %v238_v51 = vmul.f32 %v235_v49, %v933_v46 }
  0x8c   :  { %v228_v52 = vadd.f32 %v226_v47, %v217_v42  ;;  %v229_v53 = vadd.f32 %v227_v48, %v218_v43 }
  0x8d   :  { %v120_v56 = vpop.permute.xlu1 %119  ;;  %v129_v59 = vpop.permute.xlu0 %128 }
  0x8e   :  { %v239_v54 = vadd.f32 %v237_v50, %v228_v52  ;;  %v240_v55 = vadd.f32 %v238_v51, %v229_v53  ;;  %v131_v61 = vmul.f32 %v129_v59, %v912_v32  ;;  %v132_v62 = vmul.f32 %v129_v59, %v915_v33 }
  0x8f   :  { %v122_v63 = vmul.f32 %v120_v56, %v909_v31  ;;  %v123_v0 = vmul.f32 %v120_v56, %v904_v29 }
  0x90   :  { %297 = vrot.lane.b32.xlu0 %v240_v55, %s805_s6  ;;  %295 = vrot.lane.b32.xlu1 %v239_v54, %s805_s6 }
  0x91   :  { %v162_v60 = vpop.permute.xlu1 %161  ;;  %v133_v6 = vadd.f32 %v131_v61, %v122_v63  ;;  %v134_v7 = vadd.f32 %v132_v62, %v123_v0  ;;  %v171_v15 = vpop.permute.xlu0 %170 }
  0x92   :  { %v173_v19 = vmul.f32 %v171_v15, %v912_v32  ;;  %v174_v20 = vmul.f32 %v171_v15, %v915_v33  ;;  %v164_v21 = vmul.f32 %v162_v60, %v909_v31  ;;  %v165_v22 = vmul.f32 %v162_v60, %v904_v29 }
  0x94   :  { %62 = vperm.xlu0 %765, %v717_v57   ;;  %45 = vperm.xlu1 %764, %v42_v58   ;;  %v175_v24 = vadd.f32 %v173_v19, %v164_v21  ;;  %v176_v27 = vadd.f32 %v174_v20, %v165_v22 }
  0x95   :  { %v140_v3 = vpop.permute.xlu1 %139  ;;  %v182_v16 = vpop.permute.xlu0 %181 }
  0x96   :  { %v142_v4 = vmul.f32 %v140_v3, %v924_v40  ;;  %v143_v5 = vmul.f32 %v140_v3, %v927_v41  ;;  %v184_v28 = vmul.f32 %v182_v16, %v924_v40  ;;  %v185_v35 = vmul.f32 %v182_v16, %v927_v41 }
  0x98   :  { %100 = vperm.xlu0 %765, %v719_v1   ;;  %81 = vperm.xlu1 %764, %v718_v2   ;;  %v144_v9 = vadd.f32 %v142_v4, %v133_v6  ;;  %v145_v10 = vadd.f32 %v143_v5, %v134_v7  ;;  %v186_v48 = vadd.f32 %v184_v28, %v175_v24 }
  0x99   :  { %v151_v8 = vpop.permute.xlu1 %150  ;;  %v193_v17 = vpop.permute.xlu0 %192  ;;  %v187_v49 = vadd.f32 %v185_v35, %v176_v27 }
  0x9a   :  { %v153_v11 = vmul.f32 %v151_v8, %v930_v45  ;;  %v154_v12 = vmul.f32 %v151_v8, %v933_v46  ;;  %v195_v36 = vmul.f32 %v193_v17, %v930_v45  ;;  %v196_v37 = vmul.f32 %v193_v17, %v933_v46 }
  0x9c   :  { %v155_v13 = vadd.f32 %v153_v11, %v144_v9  ;;  %v156_v14 = vadd.f32 %v154_v12, %v145_v10  ;;  %v198_v54 = vadd.f32 %v196_v37, %v187_v49  ;;  %v197_v55 = vadd.f32 %v195_v36, %v186_v48  ;;  %v353_v36 = vld [vmem:[%s1175_s4] sm:$0xf] }
  0x9d   :  { %v246_v18 = vpop.permute.xlu1 %245  ;;  %v255_v23 = vpop.permute.xlu0 %254 }
  0x9e   :  { %287 = vrot.lane.b32.xlu0 %v156_v14, %s805_s6  ;;  %285 = vrot.lane.b32.xlu1 %v155_v13, %s805_s6  ;;  %v257_v39 = vmul.f32 %v255_v23, %v912_v32  ;;  %v258_v42 = vmul.f32 %v255_v23, %v915_v33  ;;  %v248_v43 = vmul.f32 %v246_v18, %v909_v31 }
  0x9f   :  { %v249_v44 = vmul.f32 %v246_v18, %v904_v29 }
  0xa0   :  { %v259_v52 = vadd.f32 %v257_v39, %v248_v43 }
  0xa1   :  { %v266_v38 = vpop.permute.xlu1 %265  ;;  %v277_v47 = vpop.permute.xlu0 %276  ;;  %v260_v53 = vadd.f32 %v258_v42, %v249_v44 }
  0xa2   :  { %v268_v50 = vmul.f32 %v266_v38, %v924_v40  ;;  %v269_v51 = vmul.f32 %v266_v38, %v927_v41  ;;  %v279_v62 = vmul.f32 %v277_v47, %v930_v45  ;;  %v280_v63 = vmul.f32 %v277_v47, %v933_v46 }
  0xa4   :  { %v270_v58 = vadd.f32 %v268_v50, %v259_v52  ;;  %v271_v59 = vadd.f32 %v269_v51, %v260_v53 }
  0xa6   :  { %v282_v0 = vadd.f32 %v280_v63, %v271_v59  ;;  %v281_v1 = vadd.f32 %v279_v62, %v270_v58 }
 0x102   :  { %v298_v56 = vpop.permute.xlu0 %297  ;;  %v296_v57 = vpop.permute.xlu1 %295 }
 0x103   :  { %v302_v60 = vadd.f32 %v298_v56, %v198_v54  ;;  %v301_v61 = vadd.f32 %v296_v57, %v197_v55  ;;  %v342_v54 = vld [vmem:[%s1174_s3] sm:$0xf] }
 0x105   :  { %307 = vrot.lane.b32.xlu0 %v302_v60, %s806_s1  ;;  %305 = vrot.lane.b32.xlu1 %v301_v61, %s806_s1 }
 0x109   :  { %317 = vrot.lane.b32.xlu0 %v282_v0, %s807_s15  ;;  %315 = vrot.lane.b32.xlu1 %v281_v1, %s807_s15  ;;  %v747_v1 = vld [vmem:[%s1173_s2 + $0x30] sm:$0xf] }
 0x113   :  { %v46_v2 = vpop.permute.xlu1 %45  ;;  %v63_v3 = vpop.permute.xlu0 %62 }
 0x114   :  { %v73_v5 = vmul.f32 %v912_v32, %v63_v3  ;;  %v74_v6 = vmul.f32 %v915_v33, %v63_v3  ;;  %v56_v7 = vmul.f32 %v909_v31, %v46_v2  ;;  %v57_v8 = vmul.f32 %v904_v29, %v46_v2  ;;  %v748_v2 = vld [vmem:[%s1173_s2 + $0x34] sm:$0xf]  ;;  %v749_v3 = vld [vmem:[%s1173_s2 + $0x38] sm:$0xf] }
 0x116   :  { %v75_v12 = vadd.f32 %v73_v5, %v56_v7  ;;  %v76_v13 = vadd.f32 %v74_v6, %v57_v8  ;;  %v739_v5 = vld [vmem:[%s1173_s2 + $0x10] sm:$0xf]  ;;  %v740_v6 = vld [vmem:[%s1173_s2 + $0x14] sm:$0xf]  ;;  %v743_v7 = vld [vmem:[%s1173_s2 + $0x20] sm:$0xf] }
 0x117   :  { %v82_v4 = vpop.permute.xlu1 %81  ;;  %v101_v11 = vpop.permute.xlu0 %100  ;;  %v744_v8 = vld [vmem:[%s1173_s2 + $0x24] sm:$0xf] }
 0x118   :  { %v92_v9 = vmul.f32 %v924_v40, %v82_v4  ;;  %v93_v10 = vmul.f32 %v927_v41, %v82_v4  ;;  %v111_v16 = vmul.f32 %v930_v45, %v101_v11  ;;  %v112_v17 = vmul.f32 %v933_v46, %v101_v11  ;;  %v750_v4 = vld [vmem:[%s1173_s2 + $0x3c] sm:$0xf] }
 0x119   :  { %v742_v11 = vld [vmem:[%s1173_s2 + $0x1c] sm:$0xf] }
 0x11a   :  { %v94_v14 = vadd.f32 %v92_v9, %v75_v12  ;;  %v95_v15 = vadd.f32 %v93_v10, %v76_v13  ;;  %v741_v9 = vld [vmem:[%s1173_s2 + $0x18] sm:$0xf]  ;;  %v745_v10 = vld [vmem:[%s1173_s2 + $0x28] sm:$0xf]  ;;  %v746_v12 = vld [vmem:[%s1173_s2 + $0x2c] sm:$0xf] }
 0x11b   :  { %v288_v32 = vpop.permute.xlu0 %287  ;;  %v286_v18 = vpop.permute.xlu1 %285  ;;  %v751_v13 = vld [vmem:[%s1173_s2 + $0x40] sm:$0xf] }
 0x11c   :  { %v114_v33 = vadd.f32 %v112_v17, %v95_v15  ;;  %v113_v19 = vadd.f32 %v111_v16, %v94_v14  ;;  %v752_v14 = vld [vmem:[%s1173_s2 + $0x44] sm:$0xf]  ;;  %v753_v15 = vld [vmem:[%s1173_s2 + $0x48] sm:$0xf]  ;;  %v754_v16 = vld [vmem:[%s1173_s2 + $0x4c] sm:$0xf] }
 0x11e   :  { %v292_v29 = vadd.f32 %v288_v32, %v114_v33  ;;  %v291_v21 = vadd.f32 %v286_v18, %v113_v19 }
 0x177   :  { %v308_v31 = vpop.permute.xlu0 %307  ;;  %v306_v20 = vpop.permute.xlu1 %305 }
 0x178   :  { %v312_v40 = vadd.f32 %v308_v31, %v292_v29  ;;  %v311_v22 = vadd.f32 %v306_v20, %v291_v21 }
 0x17b   :  { %v318_v41 = vpop.permute.xlu0 %317  ;;  %v316_v23 = vpop.permute.xlu1 %315 }
 0x17c   :  { %v322_v24 = vadd.f32 %v318_v41, %v312_v40  ;;  %v321_v27 = vadd.f32 %v316_v23, %v311_v22 }
 0x17e   :  { %v325_v28 = vsel %vm323_vm3, %v322_v24, 0.0  ;;  %v324_v45 = vsel %vm323_vm3, %v321_v27, 0.0 }
 0x17f   :  { %v326_v46 = vadd.f32 %v325_v28, %v324_v45 }
 0x181   :  { %v327_v35 = vsel %vm323_vm3, %v326_v46, 0.0 }
 0x182   :  { %328 = vadd.xlane.f32.xlu1 %v327_v35 }
 0x193   :  { %356 = vperm.xlu1 %764, %v353_v36  }
 0x20f   :  { %v329_v37 = vpop.xlane.xlu1 %328 }
 0x210   :  { %v330_v38 = vmul.f32 0.03125, %v329_v37 }
 0x212   :  { %v331_v39 = vsub.f32 %v321_v27, %v330_v38  ;;  %v332_v42 = vsub.f32 %v322_v24, %v330_v38 }
 0x213   :  { %v357_v60 = vpop.permute.xlu1 %356 }
 0x214   :  { %v333_v43 = vmul.f32 %v331_v39, %v331_v39  ;;  %v334_v44 = vmul.f32 %v332_v42, %v332_v42 }
 0x216   :  { %v335_v47 = vsel %vm323_vm3, %v333_v43, 0.0  ;;  %v336_v48 = vsel %vm323_vm3, %v334_v44, 0.0 }
 0x217   :  { %v337_v49 = vadd.f32 %v336_v48, %v335_v47 }
 0x219   :  { %v338_v50 = vsel %vm323_vm3, %v337_v49, 0.0 }
 0x21a   :  { %339 = vadd.xlane.f32.xlu0 %v338_v50  ;;  %v736_v50 = vld [vmem:[%s1173_s2 + $0x4] sm:$0xf] }
 0x2a7   :  { %v340_v51 = vpop.xlane.xlu0 %339 }
 0x2a8   :  { %v341_v52 = vmul.f32 0.03125, %v340_v51  ;;  %v375_v51 = vld [vmem:[%s1173_s2] sm:$0xf] }
 0x2aa   :  { %v343_v53 = vadd.f32 1e-05, %v341_v52 }
 0x2ac   :  { %766 = vrsqrt.f32 %v343_v53 }
 0x2b6   :  { %v767_v55 = vpop.eup %766 }
 0x2b7   :  { %v345_v56 = vmul.f32 %v767_v55, %v342_v54 }
 0x2b9   :  { %348 = vperm.xlu0 %765, %v345_v56  }
 0x338   :  { %v349_v57 = vpop.permute.xlu0 %348 }
 0x339   :  { %v351_v58 = vmul.f32 %v349_v57, %v331_v39  ;;  %v352_v59 = vmul.f32 %v349_v57, %v332_v42  ;;  %v738_v57 = vld [vmem:[%s1173_s2 + $0xc] sm:$0xf] }
 0x33b   :  { %v359_v61 = vadd.f32 %v357_v60, %v351_v58  ;;  %v360_v62 = vadd.f32 %v357_v60, %v352_v59  ;;  %v737_v58 = vld [vmem:[%s1173_s2 + $0x8] sm:$0xf] }
 0x33d   :  { %768 = vtanh.f32 %v359_v61 }
 0x33e   :  { %770 = vtanh.f32 %v360_v62 }
 0x347   :  { %v769_v63 = vpop.eup %768 }
 0x348   :  { %v771_v0 = vpop.eup %770  ;;  %365 = vrot.lane.b32.xlu1 %v769_v63, %s803_s22 }
 0x349   :  { %367 = vrot.lane.b32.xlu0 %v771_v0, %s803_s22 }
 0x34c   :  { %536 = vperm.xlu1 %764, %v747_v1  }
 0x34d   :  { %545 = vperm.xlu0 %765, %v748_v2  }
 0x350   :  { %556 = vperm.xlu1 %764, %v749_v3  }
 0x351   :  { %567 = vperm.xlu0 %765, %v750_v4  }
 0x354   :  { %452 = vperm.xlu1 %764, %v739_v5  }
 0x355   :  { %461 = vperm.xlu0 %765, %v740_v6  }
 0x358   :  { %494 = vperm.xlu1 %764, %v743_v7  }
 0x359   :  { %503 = vperm.xlu0 %765, %v744_v8  }
 0x35c   :  { %472 = vperm.xlu1 %764, %v741_v9  }
 0x35d   :  { %514 = vperm.xlu0 %765, %v745_v10  }
 0x360   :  { %483 = vperm.xlu1 %764, %v742_v11  }
 0x361   :  { %525 = vperm.xlu0 %765, %v746_v12  }
 0x364   :  { %578 = vperm.xlu1 %764, %v751_v13  }
 0x365   :  { %587 = vperm.xlu0 %765, %v752_v14  }
 0x368   :  { %598 = vperm.xlu1 %764, %v753_v15  }
 0x369   :  { %609 = vperm.xlu0 %765, %v754_v16  }
 0x3ba   :  { %v366_v17 = vpop.permute.xlu1 %365 }
 0x3bb   :  { %v368_v32 = vpop.permute.xlu0 %367  ;;  %371 = vst.msk [vmem:[#allocation2] sm:$0xf] %vm37_vm2, %v366_v17 }
 0x3bc   :  { %372 = vst.msk [vmem:[#allocation2 + $0x4] sm:$0xf] %vm37_vm2, %v368_v32 }
 0x3c2   :  { %v373_v33 = vld [vmem:[#allocation2] sm:$0xf] }
 0x3c3   :  { %v374_v18 = vld [vmem:[#allocation2 + $0x4] sm:$0xf]  ;;  %v1056_v19 = vrot.slane %v373_v33, %v899_v25  ;;  %v1065_v29 = vrot.slane %v373_v33, %v901_v26  ;;  %v1072_v27 = vrot.slane %v373_v33, %v906_v30 }
 0x3c4   :  { %v1059_v31 = vrot.slane %v374_v18, %v899_v25  ;;  %v1062_v20 = vrot.slane %v374_v18, %v901_v26  ;;  %v1075_v25 = vrot.slane %v374_v18, %v906_v30  ;;  %v1078_v28 = vrot.slane %v374_v18, %v917_v34 }
 0x3c5   :  { %v1081_v26 = vrot.slane %v373_v33, %v917_v34 }
 0x3cb   :  { %v537_v21 = vpop.permute.xlu1 %536 }
 0x3cc   :  { %v546_v40 = vpop.permute.xlu0 %545  ;;  %v539_v22 = vmul.f32 %v537_v21, %v1056_v19  ;;  %v540_v41 = vmul.f32 %v537_v21, %v1059_v31 }
 0x3cd   :  { %v548_v23 = vmul.f32 %v546_v40, %v1065_v29  ;;  %v549_v24 = vmul.f32 %v546_v40, %v1062_v20 }
 0x3cf   :  { %v557_v45 = vpop.permute.xlu1 %556  ;;  %v550_v46 = vadd.f32 %v548_v23, %v539_v22  ;;  %v551_v35 = vadd.f32 %v549_v24, %v540_v41 }
 0x3d0   :  { %v568_v36 = vpop.permute.xlu0 %567  ;;  %v559_v37 = vmul.f32 %v557_v45, %v1072_v27  ;;  %v560_v38 = vmul.f32 %v557_v45, %v1075_v25 }
 0x3d1   :  { %v570_v39 = vmul.f32 %v568_v36, %v1081_v26  ;;  %v571_v42 = vmul.f32 %v568_v36, %v1078_v28 }
 0x3d2   :  { %v561_v30 = vadd.f32 %v559_v37, %v550_v46  ;;  %v562_v43 = vadd.f32 %v560_v38, %v551_v35 }
 0x3d3   :  { %v453_v44 = vpop.permute.xlu1 %452 }
 0x3d4   :  { %v573_v47 = vadd.f32 %v571_v42, %v562_v43  ;;  %v572_v48 = vadd.f32 %v570_v39, %v561_v30  ;;  %v462_v34 = vpop.permute.xlu0 %461  ;;  %v455_v52 = vmul.f32 %v453_v44, %v1056_v19  ;;  %v456_v55 = vmul.f32 %v453_v44, %v1059_v31 }
 0x3d5   :  { %v464_v53 = vmul.f32 %v462_v34, %v1065_v29  ;;  %v465_v54 = vmul.f32 %v462_v34, %v1062_v20 }
 0x3d6   :  { %630 = vrot.lane.b32.xlu0 %v573_v47, %s805_s6  ;;  %628 = vrot.lane.b32.xlu1 %v572_v48, %s805_s6 }
 0x3d7   :  { %v495_v49 = vpop.permute.xlu1 %494  ;;  %v466_v61 = vadd.f32 %v464_v53, %v455_v52  ;;  %v467_v62 = vadd.f32 %v465_v54, %v456_v55 }
 0x3d8   :  { %v504_v6 = vpop.permute.xlu0 %503  ;;  %v497_v12 = vmul.f32 %v495_v49, %v1056_v19  ;;  %v498_v13 = vmul.f32 %v495_v49, %v1059_v31 }
 0x3d9   :  { %v506_v10 = vmul.f32 %v504_v6, %v1065_v29  ;;  %v507_v11 = vmul.f32 %v504_v6, %v1062_v20 }
 0x3da   :  { %395 = vperm.xlu0 %765, %v736_v50   ;;  %378 = vperm.xlu1 %764, %v375_v51  }
 0x3db   :  { %v473_v56 = vpop.permute.xlu1 %472  ;;  %v508_v17 = vadd.f32 %v506_v10, %v497_v12  ;;  %v509_v32 = vadd.f32 %v507_v11, %v498_v13 }
 0x3dc   :  { %v475_v59 = vmul.f32 %v473_v56, %v1072_v27  ;;  %v476_v60 = vmul.f32 %v473_v56, %v1075_v25  ;;  %v515_v7 = vpop.permute.xlu0 %514 }
 0x3dd   :  { %v517_v15 = vmul.f32 %v515_v7, %v1072_v27  ;;  %v518_v16 = vmul.f32 %v515_v7, %v1075_v25 }
 0x3de   :  { %433 = vperm.xlu0 %765, %v738_v57   ;;  %414 = vperm.xlu1 %764, %v737_v58   ;;  %v477_v0 = vadd.f32 %v475_v59, %v466_v61  ;;  %v478_v1 = vadd.f32 %v476_v60, %v467_v62 }
 0x3df   :  { %v484_v63 = vpop.permute.xlu1 %483  ;;  %v519_v45 = vadd.f32 %v517_v15, %v508_v17  ;;  %v520_v46 = vadd.f32 %v518_v16, %v509_v32  ;;  %v685_v15 = vld [vmem:[%s1175_s4] sm:$0xf] }
 0x3e0   :  { %v486_v2 = vmul.f32 %v484_v63, %v1081_v26  ;;  %v487_v3 = vmul.f32 %v484_v63, %v1078_v28  ;;  %v526_v8 = vpop.permute.xlu0 %525 }
 0x3e1   :  { %v528_v18 = vmul.f32 %v526_v8, %v1081_v26  ;;  %v529_v33 = vmul.f32 %v526_v8, %v1078_v28 }
 0x3e2   :  { %v488_v4 = vadd.f32 %v486_v2, %v477_v0  ;;  %v489_v5 = vadd.f32 %v487_v3, %v478_v1 }
 0x3e3   :  { %v579_v9 = vpop.permute.xlu1 %578  ;;  %v531_v39 = vadd.f32 %v529_v33, %v520_v46  ;;  %v530_v42 = vadd.f32 %v528_v18, %v519_v45 }
 0x3e4   :  { %620 = vrot.lane.b32.xlu0 %v489_v5, %s805_s6  ;;  %618 = vrot.lane.b32.xlu1 %v488_v4, %s805_s6  ;;  %v588_v14 = vpop.permute.xlu0 %587  ;;  %v581_v41 = vmul.f32 %v579_v9, %v1056_v19  ;;  %v582_v23 = vmul.f32 %v579_v9, %v1059_v31 }
 0x3e5   :  { %v590_v40 = vmul.f32 %v588_v14, %v1065_v29  ;;  %v591_v22 = vmul.f32 %v588_v14, %v1062_v20 }
 0x3e7   :  { %v599_v21 = vpop.permute.xlu1 %598  ;;  %v592_v37 = vadd.f32 %v590_v40, %v581_v41  ;;  %v593_v38 = vadd.f32 %v591_v22, %v582_v23 }
 0x3e8   :  { %v610_v24 = vpop.permute.xlu0 %609  ;;  %v601_v35 = vmul.f32 %v599_v21, %v1072_v27  ;;  %v602_v36 = vmul.f32 %v599_v21, %v1075_v25 }
 0x3e9   :  { %v612_v49 = vmul.f32 %v610_v24, %v1081_v26  ;;  %v613_v50 = vmul.f32 %v610_v24, %v1078_v28 }
 0x3ea   :  { %v603_v44 = vadd.f32 %v601_v35, %v592_v37  ;;  %v604_v47 = vadd.f32 %v602_v36, %v593_v38  ;;  %v674_v35 = vld [vmem:[%s1174_s3] sm:$0xf]  ;;  %s808_s3 = smov [#allocation3]  }
 0x3eb   :  { %s706_s17 = sshll.u32 %s808_s3, 4  ;;  %s707_s17 = int_to_ptr.vmem [resolvable:$true] %s706_s17 }
 0x3ec   :  { %v615_v51 = vadd.f32 %v613_v50, %v604_v47  ;;  %v614_v52 = vadd.f32 %v612_v49, %v603_v44  ;;  %v694_v44 = vld [vmem:[%s1171_s0 + $0x4] sm:$0xf]  ;;  %s778_s18 = scalar_lea.vmem %s707_s17, 128  ;;  %p783_p1 = scmp.lt.s32.totalorder %s707_s17, %s707_s17 }
 0x3ed   :  { %p779_p0 = scmp.ne.s32.totalorder %s707_s17, %s778_s18  ;;  %p784_p2 = scmp.lt.s32.totalorder %s778_s18, %s778_s18 }
 0x3ef   :  { %p785_p3 = por %p784_p2, %p783_p1 }
 0x3f1   :  { %p786_p4 = pnand %p785_p3, %p779_p0 }
 0x448   :  { %v631_v30 = vpop.permute.xlu0 %630  ;;  %v629_v43 = vpop.permute.xlu1 %628 }
 0x449   :  { %v635_v48 = vadd.f32 %v631_v30, %v531_v39  ;;  %v634_v34 = vadd.f32 %v629_v43, %v530_v42  ;;  %v693_v43 = vld [vmem:[%s1171_s0] sm:$0xf] }
 0x44b   :  { %640 = vrot.lane.b32.xlu0 %v635_v48, %s806_s1  ;;  %638 = vrot.lane.b32.xlu1 %v634_v34, %s806_s1 }
 0x44f   :  { %650 = vrot.lane.b32.xlu0 %v615_v51, %s807_s15  ;;  %648 = vrot.lane.b32.xlu1 %v614_v52, %s807_s15 }
 0x459   :  { %v379_v53 = vpop.permute.xlu1 %378  ;;  %v396_v54 = vpop.permute.xlu0 %395 }
 0x45a   :  { %v406_v56 = vmul.f32 %v1065_v29, %v396_v54  ;;  %v407_v57 = vmul.f32 %v1062_v20, %v396_v54  ;;  %v389_v58 = vmul.f32 %v1056_v19, %v379_v53  ;;  %v390_v59 = vmul.f32 %v1059_v31, %v379_v53 }
 0x45c   :  { %v408_v63 = vadd.f32 %v406_v56, %v389_v58  ;;  %v409_v0 = vadd.f32 %v407_v57, %v390_v59 }
 0x45d   :  { %v415_v55 = vpop.permute.xlu1 %414  ;;  %v434_v62 = vpop.permute.xlu0 %433 }
 0x45e   :  { %v425_v60 = vmul.f32 %v1072_v27, %v415_v55  ;;  %v426_v61 = vmul.f32 %v1075_v25, %v415_v55  ;;  %v444_v3 = vmul.f32 %v1081_v26, %v434_v62  ;;  %v445_v4 = vmul.f32 %v1078_v28, %v434_v62 }
 0x460   :  { %v427_v1 = vadd.f32 %v425_v60, %v408_v63  ;;  %v428_v2 = vadd.f32 %v426_v61, %v409_v0 }
 0x461   :  { %v621_v29 = vpop.permute.xlu0 %620  ;;  %v619_v5 = vpop.permute.xlu1 %618 }
 0x462   :  { %v447_v20 = vadd.f32 %v445_v4, %v428_v2  ;;  %v446_v6 = vadd.f32 %v444_v3, %v427_v1 }
 0x464   :  { %v625_v31 = vadd.f32 %v621_v29, %v447_v20  ;;  %v624_v8 = vadd.f32 %v619_v5, %v446_v6 }
 0x4bd   :  { %v641_v19 = vpop.permute.xlu0 %640  ;;  %v639_v7 = vpop.permute.xlu1 %638 }
 0x4be   :  { %v645_v27 = vadd.f32 %v641_v19, %v625_v31  ;;  %v644_v9 = vadd.f32 %v639_v7, %v624_v8 }
 0x4c1   :  { %v651_v25 = vpop.permute.xlu0 %650  ;;  %v649_v10 = vpop.permute.xlu1 %648 }
 0x4c2   :  { %v655_v11 = vadd.f32 %v651_v25, %v645_v27  ;;  %v654_v12 = vadd.f32 %v649_v10, %v644_v9 }
 0x4c4   :  { %v657_v13 = vsel %vm323_vm3, %v655_v11, 0.0  ;;  %v656_v26 = vsel %vm323_vm3, %v654_v12, 0.0 }
 0x4c5   :  { %v658_v14 = vadd.f32 %v657_v13, %v656_v26 }
 0x4c7   :  { %v659_v28 = vsel %vm323_vm3, %v658_v14, 0.0 }
 0x4c8   :  { %660 = vadd.xlane.f32.xlu1 %v659_v28 }
 0x4d9   :  { %688 = vperm.xlu1 %764, %v685_v15  }
 0x555   :  { %v661_v16 = vpop.xlane.xlu1 %660 }
 0x556   :  { %v662_v17 = vmul.f32 0.03125, %v661_v16 }
 0x558   :  { %v663_v32 = vsub.f32 %v654_v12, %v662_v17  ;;  %v664_v18 = vsub.f32 %v655_v11, %v662_v17 }
 0x559   :  { %v689_v30 = vpop.permute.xlu1 %688 }
 0x55a   :  { %v665_v33 = vmul.f32 %v663_v32, %v663_v32  ;;  %v666_v21 = vmul.f32 %v664_v18, %v664_v18 }
 0x55c   :  { %v667_v40 = vsel %vm323_vm3, %v665_v33, 0.0  ;;  %v668_v22 = vsel %vm323_vm3, %v666_v21, 0.0 }
 0x55d   :  { %v669_v41 = vadd.f32 %v668_v22, %v667_v40 }
 0x55f   :  { %v670_v23 = vsel %vm323_vm3, %v669_v41, 0.0 }
 0x560   :  { %671 = vadd.xlane.f32.xlu0 %v670_v23 }
 0x5ed   :  { %v672_v24 = vpop.xlane.xlu0 %671 }
 0x5ee   :  { %v673_v45 = vmul.f32 0.03125, %v672_v24 }
 0x5f0   :  { %v675_v46 = vadd.f32 1e-05, %v673_v45 }
 0x5f2   :  { %772 = vrsqrt.f32 %v675_v46 }
 0x5fc   :  { %v773_v36 = vpop.eup %772 }
 0x5fd   :  { %v677_v37 = vmul.f32 %v773_v36, %v674_v35 }
 0x5ff   :  { %680 = vperm.xlu0 %765, %v677_v37  }
 0x67e   :  { %v681_v38 = vpop.permute.xlu0 %680 }
 0x67f   :  { %v683_v39 = vmul.f32 %v681_v38, %v663_v32  ;;  %v684_v42 = vmul.f32 %v681_v38, %v664_v18 }
 0x681   :  { %v691_v47 = vadd.f32 %v689_v30, %v683_v39  ;;  %v692_v48 = vadd.f32 %v689_v30, %v684_v42 }
 0x683   :  { %v695_v34 = vadd.f32 %v693_v43, %v691_v47  ;;  %v696_v49 = vadd.f32 %v694_v44, %v692_v48 }
 0x685   :  { %774 = vtanh.f32 %v695_v34 }
 0x686   :  { %776 = vtanh.f32 %v696_v49 }
 0x68f   :  { %v775_v50 = vpop.eup %774 }
 0x690   :  { %v777_v51 = vpop.eup %776  ;;  %699 = vst.msk [vmem:[#allocation3] sm:$0xf] %vm323_vm3, %v775_v50 }
 0x691   :  { %700 = vst.msk [vmem:[#allocation3 + $0x4] sm:$0xf] %vm323_vm3, %v777_v51 }
 0x692   :  { %789 = shalt.err (!%p786_p4)
}
 0x693   :  { %s790_s20 = scalar_lea.hbm %s1176_s5, 128 }
 0x694   :  { %p791_p5 = scmp.ne.s32.totalorder %s1176_s5, %s790_s20  ;;  %p794_p6 = scmp.lt.u32.totalorder %s790_s20, %s1176_s5 }
 0x696   :  { %p796_p7 = pnand %p794_p6, %p791_p5 }
 0x698   :  { %799 = shalt.err (!%p796_p7)
}
 0x699   :  { %s809_s26 = smov 64   ;;  %s810_s27 = smov 4  }
 0x69a   :  { %712 = dma.vmem_to_hbm [thread:$0]  %s707_s17, 128, %s1176_s5, [#allocation4], %s809_s26, %s809_s26, %s810_s27  }
 0x69b   :  { %800 = dma.done.wait [#allocation4], 128  }
 0x69c   :  { %801 = vsyncadd [#allocation4], 4294967168 }
 0x69d   :  { %716 = vsyncpa [#allocation4], 1 }

</bundles_post_ra>
